<compile_context>
chip_gen: v6e
topology: v6e:2x2x1
jax: 0.10.0
libtpu: 0.0.40
codegen_flags: <defaults>
</compile_context>

<pallas_src>
import functools

import jax
import jax.numpy as jnp
from jax import lax
from jax.experimental import pallas as pl
from jax.experimental.pallas import tpu as pltpu


_NEG_INF = -1e30  # large finite negative; exp() underflows cleanly to 0.0


def _round_up(x, m):
    return ((x + m - 1) // m) * m


def _tiles_and_vmem_cap():
    """Generation-aware (row_tile, col_tile, vmem_capacity_bytes)."""
    vmem_cap = 64 << 20  # conservative default: v7x has 64 MiB VMEM per TensorCore
    try:
        cap = getattr(pltpu.get_tpu_info(), "vmem_capacity_bytes", None)
        if cap:
            vmem_cap = int(cap)
    except Exception:
        pass
    if vmem_cap >= (100 << 20):     # v5e / v6e class: 128 MiB VMEM -> bigger tiles
        tile_r, tile_c = 512, 1024
    else:                           # v7x class: 64 MiB VMEM -> smaller tiles
        tile_r, tile_c = 256, 512
    return tile_r, tile_c, vmem_cap


def _supcon_kernel(a_ref, b_ref, la_ref, lb_ref, out_ref,
                   m_scr, d_scr, ps_scr, pc_scr, *,
                   inv_temp, loss_scale, n_contrast, tr, tc, compute_dtype):
    """One (row_tile, col_tile) step of the online SupCon reduction.

    a_ref:  (tr, D)  anchor feature tile
    b_ref:  (tc, D)  contrast feature tile
    la_ref: (tr, 1)  int32 anchor labels
    lb_ref: (1, tc)  int32 contrast labels
    out_ref:(tr, 1)  per-anchor loss, written on the last column step
    scratch (tr, 1) f32: running max / running sum(exp) / sum(pos*s) / sum(pos)
    """
    i = pl.program_id(0)
    j = pl.program_id(1)
    nj = pl.num_programs(1)

    @pl.when(j == 0)
    def _init():
        m_scr[...] = jnp.full(m_scr.shape, _NEG_INF, jnp.float32)
        d_scr[...] = jnp.zeros(d_scr.shape, jnp.float32)
        ps_scr[...] = jnp.zeros(ps_scr.shape, jnp.float32)
        pc_scr[...] = jnp.zeros(pc_scr.shape, jnp.float32)

    # Fold 1/temperature into the (tr, D) anchor operand (cheap VPU pass),
    # then feed the MXU in the compute dtype (bf16 fast path) with f32 acc.
    a = (a_ref[...].astype(jnp.float32) * inv_temp).astype(compute_dtype)
    b = b_ref[...].astype(compute_dtype)

    # s[r, c] = <anchor_r, contrast_c> / temperature
    s = lax.dot_general(a, b, (((1,), (1,)), ((), ())),
                        preferred_element_type=jnp.float32)       # (tr, tc) f32

    # Boolean predicates only -- never materialized as f32 [N, N] masks.
    row_ids = i * tr + lax.broadcasted_iota(jnp.int32, (tr, tc), 0)
    col_ids = j * tc + lax.broadcasted_iota(jnp.int32, (tr, tc), 1)
    valid = jnp.logical_and(row_ids != col_ids,        # remove self-contrast
                            col_ids < n_contrast)      # remove column padding
    pos = jnp.logical_and(valid, la_ref[...] == lb_ref[...])

    # Online (flash-style) log-sum-exp over the column axis.
    s_valid = jnp.where(valid, s, _NEG_INF)
    m_prev = m_scr[...]
    m_new = jnp.maximum(m_prev, jnp.max(s_valid, axis=1, keepdims=True))
    alpha = jnp.exp(m_prev - m_new)
    p = jnp.where(valid, jnp.exp(s - m_new), 0.0)
    d_scr[...] = alpha * d_scr[...] + jnp.sum(p, axis=1, keepdims=True)
    m_scr[...] = m_new

    # sum(pos * log_prob) = sum(pos*s) - sum(pos) * (row_max + log(denom))
    ps_scr[...] += jnp.sum(jnp.where(pos, s, 0.0), axis=1, keepdims=True)
    pc_scr[...] += jnp.sum(pos.astype(jnp.float32), axis=1, keepdims=True)

    @pl.when(j == nj - 1)
    def _finalize():
        pc = pc_scr[...]
        pc_safe = jnp.maximum(pc, 1.0)  # guard anchors without any positive pair
        mlpp = (ps_scr[...] - pc * m_scr[...]) / pc_safe - jnp.log(d_scr[...])
        # loss_scale = -(temperature / base_temperature)
        out_ref[...] = jnp.where(pc > 0.0, loss_scale * mlpp, 0.0)


@functools.partial(jax.jit, static_argnames=(
    "temperature", "base_temperature", "loss_weight", "contrast_mode",
    "matmul_dtype"))
def _supcon_forward(features, labels, *, temperature, base_temperature,
                    loss_weight, contrast_mode, matmul_dtype):
    """Jittable hot path: prep + tiled Pallas kernel + tiny final reduction."""
    bsz, n_views, dim = features.shape
    n = n_views * bsz

    tile_r, tile_c, vmem_cap = _tiles_and_vmem_cap()
    tc = min(tile_c, max(128, _round_up(n, 128)))
    tr = min(tile_r, tc)
    n_pad = _round_up(n, tc)

    # contrast_feature = cat(unbind(features, dim=1), dim=0) -> [n, dim]
    cf = jnp.transpose(features, (1, 0, 2)).reshape(n, dim)
    store_dtype = jnp.bfloat16 if matmul_dtype == jnp.bfloat16 else cf.dtype
    cf = cf.astype(store_dtype)
    cf = jnp.pad(cf, ((0, n_pad - n), (0, 0)))

    lab_full = jnp.tile(labels.reshape(-1).astype(jnp.int32), n_views)
    lab_row = jnp.pad(lab_full, (0, n_pad - n),
                      constant_values=-1).reshape(1, n_pad)

    if contrast_mode == "all":
        n_anchor = n
        n_anchor_pad = n_pad
        anchor = cf
        lab_anchor = lab_row.reshape(n_pad, 1)
    else:  # "one": anchors are view-0 features == first `bsz` contrast rows
        n_anchor = bsz
        n_anchor_pad = _round_up(bsz, tr)
        anchor = jnp.pad(cf[:bsz], ((0, n_anchor_pad - bsz), (0, 0)))
        lab_anchor = jnp.pad(labels.reshape(-1).astype(jnp.int32),
                             (0, n_anchor_pad - bsz),
                             constant_values=-1).reshape(n_anchor_pad, 1)

    grid = (n_anchor_pad // tr, n_pad // tc)

    # Scoped-VMEM budget: (tr,tc) temporaries + double-buffered feature tiles
    # + lane-padded small operands, with headroom; capped below physical VMEM.
    itemsize = jnp.dtype(store_dtype).itemsize
    est = (8 * tr * tc * 4
           + 2 * 2 * (tr + tc) * dim * itemsize
           + 12 * tr * 128 * 4 + 64 * tc * 4
           + (4 << 20))
    vmem_limit = int(min(max(2 * est, 32 << 20), int(vmem_cap * 0.7)))

    kernel = functools.partial(
        _supcon_kernel,
        inv_temp=float(1.0 / temperature),
        loss_scale=float(-(temperature / base_temperature)),
        n_contrast=n,
        tr=tr, tc=tc,
        compute_dtype=matmul_dtype,
    )

    per_anchor = pl.pallas_call(
        kernel,
        out_shape=jax.ShapeDtypeStruct((n_anchor_pad, 1), jnp.float32),
        grid=grid,
        in_specs=[
            pl.BlockSpec((tr, dim), lambda i, j: (i, 0)),   # anchor features
            pl.BlockSpec((tc, dim), lambda i, j: (j, 0)),   # contrast features
            pl.BlockSpec((tr, 1), lambda i, j: (i, 0)),     # anchor labels (int32)
            pl.BlockSpec((1, tc), lambda i, j: (0, j)),     # contrast labels (int32)
        ],
        out_specs=pl.BlockSpec((tr, 1), lambda i, j: (i, 0)),
        scratch_shapes=[pltpu.VMEM((tr, 1), jnp.float32)] * 4,
        compiler_params=pltpu.CompilerParams(
            dimension_semantics=("parallel", "arbitrary"),
            vmem_limit_bytes=vmem_limit,
        ),
    )(anchor, cf, lab_anchor, lab_row)

    # Tiny O(N) final reduction (padded rows already zeroed / sliced away).
    loss = loss_weight * jnp.mean(per_anchor[:n_anchor, 0])
    return loss


def supcon_loss(features, labels, *, temperature=0.07, contrast_mode="all",
                base_temperature=0.07, loss_weight=1.0, min_points=None,
                matmul_dtype=jnp.bfloat16, check_min_points=True):
    """JAX/Pallas equivalent of SupConLoss.forward (gather=False, mask=None)."""
    if min_points is None:
        min_points = 2

    if features.ndim < 3:
        raise ValueError("`features` needs to be [bsz, n_views, ...], "
                         "at least 3 dimensions are required")
    if features.ndim > 3:
        features = features.reshape(features.shape[0], features.shape[1], -1)

    batch_size = features.shape[0]
    if labels.shape[0] != batch_size:
        raise ValueError("Num of labels does not match num of features")
    if contrast_mode not in ("all", "one"):
        raise ValueError("Unknown mode: {}".format(contrast_mode))

    if check_min_points:
        # Mirrors the PyTorch module's early `return None`.  This is a
        # host-side scalar read; pass check_min_points=False (and gate at the
        # caller) to keep the hot path fully async / jittable.
        num_t = float(jnp.sum(labels))
        if num_t < min_points or batch_size - min_points < 2:
            return None

    return _supcon_forward(
        features, labels,
        temperature=float(temperature),
        base_temperature=float(base_temperature),
        loss_weight=float(loss_weight),
        contrast_mode=contrast_mode,
        matmul_dtype=matmul_dtype,
    )


def _reference_supcon(features, labels, temperature=0.07, base_temperature=0.07,
                      loss_weight=1.0, contrast_mode="all"):
    """Pure-JAX (f32, highest precision) reference for correctness checking."""
    b, v, d = features.shape
    n = v * b
    cf = jnp.transpose(features, (1, 0, 2)).reshape(n, d).astype(jnp.float32)
    if contrast_mode == "all":
        anchor = cf
    else:
        anchor = cf[:b]
    na = anchor.shape[0]
    s = jnp.matmul(anchor, cf.T, precision=jax.lax.Precision.HIGHEST) / temperature
    logits = s - jnp.max(s, axis=1, keepdims=True)
    li = jnp.arange(na)[:, None]
    lj = jnp.arange(n)[None, :]
    logits_mask = (li != lj).astype(jnp.float32)
    labf = jnp.tile(labels.reshape(-1), v)
    pos = (labf[:na, None] == labf[None, :]).astype(jnp.float32) * logits_mask
    exp_logits = jnp.exp(logits) * logits_mask
    log_prob = logits - jnp.log(exp_logits.sum(1, keepdims=True))
    mlpp = (pos * log_prob).sum(1) / pos.sum(1)
    loss = -(temperature / base_temperature) * mlpp
    return loss_weight * loss.mean()


if __name__ == "__main__":
    key = jax.random.PRNGKey(0)
    k_feat, _ = jax.random.split(key)

    # small shapes: bsz=8, n_views=2, feature dim=32
    B, V, D = 8, 2, 32
    features = jax.random.normal(k_feat, (B, V, D), dtype=jnp.float32)
    # L2-normalize features (typical for SupCon inputs)
    features = features / jnp.linalg.norm(features, axis=-1, keepdims=True)
    # binary labels with enough positives (num_T >= min_points)
    labels = jnp.array([1, 0, 1, 1, 0, 0, 1, 0], dtype=jnp.int32)

    ref_all = _reference_supcon(features, labels)
    ref_one = _reference_supcon(features, labels, contrast_mode="one")

    # f32 MXU path ('all' mode) -- tight check against the pure-JAX reference.
    loss_f32 = supcon_loss(features, labels, matmul_dtype=jnp.float32)
    assert loss_f32 is not None
    loss_f32 = jax.block_until_ready(loss_f32)
    assert jnp.allclose(loss_f32, ref_all, atol=1e-3, rtol=1e-3), (loss_f32, ref_all)

    # default bf16 MXU fast path -- bf16-level tolerance.
    loss_bf16 = supcon_loss(features, labels)
    assert loss_bf16 is not None
    loss_bf16 = jax.block_until_ready(loss_bf16)
    assert jnp.allclose(loss_bf16, ref_all, atol=3e-2, rtol=3e-2), (loss_bf16, ref_all)

    # contrast_mode='one' path.
    loss_one = supcon_loss(features, labels, contrast_mode="one",
                           matmul_dtype=jnp.float32)
    assert loss_one is not None
    loss_one = jax.block_until_ready(loss_one)
    assert jnp.allclose(loss_one, ref_one, atol=1e-3, rtol=1e-3), (loss_one, ref_one)

    print("KERNEL_OK")
</pallas_src>

<mosaic_0001>
module attributes {stable_mosaic.version = 11 : i64} {
  func.func @_supcon_kernel(%arg0: i32, %arg1: i32, %arg2: memref<128x32xf32, #tpu.memory_space<vmem>>, %arg3: memref<128x32xf32, #tpu.memory_space<vmem>>, %arg4: memref<128x1xi32, #tpu.memory_space<vmem>>, %arg5: memref<1x128xi32, #tpu.memory_space<vmem>>, %arg6: memref<128x1xf32, #tpu.memory_space<vmem>>, %arg7: memref<128x1xf32, #tpu.memory_space<vmem>>, %arg8: memref<128x1xf32, #tpu.memory_space<vmem>>, %arg9: memref<128x1xf32, #tpu.memory_space<vmem>>, %arg10: memref<128x1xf32, #tpu.memory_space<vmem>>) attributes {dimension_semantics = [#tpu.dimension_semantics<parallel>, #tpu.dimension_semantics<arbitrary>], iteration_bounds = array<i64: 1, 1>, scalar_prefetch = 0 : i64, scratch_operands = 4 : i64, tpu.core_type = #tpu.core_type<tc>, window_params = [{transform_indices = @transform_0, window_bounds = array<i64: 128, 32>}, {transform_indices = @transform_1, window_bounds = array<i64: 128, 32>}, {transform_indices = @transform_2, window_bounds = array<i64: 128, 1>}, {transform_indices = @transform_3, window_bounds = array<i64: 1, 128>}, {transform_indices = @transform_4, window_bounds = array<i64: 128, 1>}]} {
    %c0_i32 = arith.constant 0 : i32
    %0 = arith.cmpi eq, %arg1, %c0_i32 : i32
    %1 = arith.extui %0 : i1 to i32
    %c0_i32_0 = arith.constant 0 : i32
    %2 = arith.cmpi ne, %1, %c0_i32_0 : i32
    scf.if %2 {
      %cst_35 = arith.constant -1.000000e+30 : f32
      %63 = vector.broadcast %cst_35 : f32 to vector<128x1xf32>
      %c0_36 = arith.constant 0 : index
      %c0_37 = arith.constant 0 : index
      %64 = vector.load %arg7[%c0_36, %c0_37] : memref<128x1xf32, #tpu.memory_space<vmem>>, vector<128x1xf32>
      tpu.vector_store %arg7[%c0_36, %c0_37], %63 {strides = array<i32>} : memref<128x1xf32, #tpu.memory_space<vmem>>, vector<128x1xf32>,
      %cst_38 = arith.constant 0.000000e+00 : f32
      %65 = vector.broadcast %cst_38 : f32 to vector<128x1xf32>
      %c0_39 = arith.constant 0 : index
      %c0_40 = arith.constant 0 : index
      %66 = vector.load %arg8[%c0_39, %c0_40] : memref<128x1xf32, #tpu.memory_space<vmem>>, vector<128x1xf32>
      tpu.vector_store %arg8[%c0_39, %c0_40], %65 {strides = array<i32>} : memref<128x1xf32, #tpu.memory_space<vmem>>, vector<128x1xf32>,
      %cst_41 = arith.constant 0.000000e+00 : f32
      %67 = vector.broadcast %cst_41 : f32 to vector<128x1xf32>
      %c0_42 = arith.constant 0 : index
      %c0_43 = arith.constant 0 : index
      %68 = vector.load %arg9[%c0_42, %c0_43] : memref<128x1xf32, #tpu.memory_space<vmem>>, vector<128x1xf32>
      tpu.vector_store %arg9[%c0_42, %c0_43], %67 {strides = array<i32>} : memref<128x1xf32, #tpu.memory_space<vmem>>, vector<128x1xf32>,
      %cst_44 = arith.constant 0.000000e+00 : f32
      %69 = vector.broadcast %cst_44 : f32 to vector<128x1xf32>
      %c0_45 = arith.constant 0 : index
      %c0_46 = arith.constant 0 : index
      %70 = vector.load %arg10[%c0_45, %c0_46] : memref<128x1xf32, #tpu.memory_space<vmem>>, vector<128x1xf32>
      tpu.vector_store %arg10[%c0_45, %c0_46], %69 {strides = array<i32>} : memref<128x1xf32, #tpu.memory_space<vmem>>, vector<128x1xf32>,
    } else {
    }
    %c0 = arith.constant 0 : index
    %c0_1 = arith.constant 0 : index
    %3 = vector.load %arg2[%c0, %c0_1] : memref<128x32xf32, #tpu.memory_space<vmem>>, vector<128x32xf32>
    %cst = arith.constant 14.2857141 : f32
    %4 = vector.broadcast %cst : f32 to vector<128x32xf32>
    %5 = arith.mulf %3, %4 : vector<128x32xf32>
    %c0_2 = arith.constant 0 : index
    %c0_3 = arith.constant 0 : index
    %6 = vector.load %arg3[%c0_2, %c0_3] : memref<128x32xf32, #tpu.memory_space<vmem>>, vector<128x32xf32>
    %cst_4 = arith.constant dense<0.000000e+00> : vector<128x128xf32>
    %7 = tpu.matmul %5, %6, %cst_4 {dimension_numbers = #tpu.dot_dimension_numbers<[1], [1], [0], [0], [0, 0, 1, 0], [], []>} : vector<128x32xf32>, vector<128x32xf32>, vector<128x128xf32> -> vector<128x128xf32>
    %c128_i32 = arith.constant 128 : i32
    %8 = arith.muli %arg0, %c128_i32 : i32
    %9 = tpu.iota {dimensions = array<i32: 0>} : vector<128x128xi32>
    %10 = vector.broadcast %8 : i32 to vector<128x128xi32>
    %11 = arith.addi %10, %9 : vector<128x128xi32>
    %c128_i32_5 = arith.constant 128 : i32
    %12 = arith.muli %arg1, %c128_i32_5 : i32
    %13 = tpu.iota {dimensions = array<i32: 1>} : vector<128x128xi32>
    %14 = vector.broadcast %12 : i32 to vector<128x128xi32>
    %15 = arith.addi %14, %13 : vector<128x128xi32>
    %16 = arith.cmpi ne, %11, %15 : vector<128x128xi32>
    %c16_i32 = arith.constant 16 : i32
    %17 = vector.broadcast %c16_i32 : i32 to vector<128x128xi32>
    %18 = arith.cmpi slt, %15, %17 : vector<128x128xi32>
    %19 = arith.andi %16, %18 : vector<128x128xi1>
    %c0_6 = arith.constant 0 : index
    %c0_7 = arith.constant 0 : index
    %20 = vector.load %arg4[%c0_6, %c0_7] : memref<128x1xi32, #tpu.memory_space<vmem>>, vector<128x1xi32>
    %c0_8 = arith.constant 0 : index
    %c0_9 = arith.constant 0 : index
    %21 = vector.load %arg5[%c0_8, %c0_9] : memref<1x128xi32, #tpu.memory_space<vmem>>, vector<1x128xi32>
    %22 = vector.broadcast %20 : vector<128x1xi32> to vector<128x128xi32>
    %23 = vector.broadcast %21 : vector<1x128xi32> to vector<128x128xi32>
    %24 = arith.cmpi eq, %22, %23 : vector<128x128xi32>
    %25 = arith.andi %19, %24 : vector<128x128xi1>
    %cst_10 = arith.constant -1.000000e+30 : f32
    %26 = vector.broadcast %cst_10 : f32 to vector<128x128xf32>
    %27 = arith.select %19, %7, %26 : vector<128x128xi1>, vector<128x128xf32>
    %c0_11 = arith.constant 0 : index
    %c0_12 = arith.constant 0 : index
    %28 = vector.load %arg7[%c0_11, %c0_12] : memref<128x1xf32, #tpu.memory_space<vmem>>, vector<128x1xf32>
    %cst_13 = arith.constant dense<0xFF800000> : vector<128xf32>
    %29 = vector.multi_reduction <maximumf>, %27, %cst_13 [1] : vector<128x128xf32> to vector<128xf32>
    %30 = vector.shape_cast %29 : vector<128xf32> to vector<128x1xf32>
    %31 = arith.maximumf %28, %30 : vector<128x1xf32>
    %32 = arith.subf %28, %31 : vector<128x1xf32>
    %33 = math.exp %32 : vector<128x1xf32>
    %34 = vector.broadcast %31 : vector<128x1xf32> to vector<128x128xf32>
    %35 = arith.subf %7, %34 : vector<128x128xf32>
    %36 = math.exp %35 : vector<128x128xf32>
    %cst_14 = arith.constant 0.000000e+00 : f32
    %37 = vector.broadcast %cst_14 : f32 to vector<128x128xf32>
    %38 = arith.select %19, %36, %37 : vector<128x128xi1>, vector<128x128xf32>
    %c0_15 = arith.constant 0 : index
    %c0_16 = arith.constant 0 : index
    %39 = vector.load %arg8[%c0_15, %c0_16] : memref<128x1xf32, #tpu.memory_space<vmem>>, vector<128x1xf32>
    %40 = arith.mulf %33, %39 : vector<128x1xf32>
    %cst_17 = arith.constant dense<0.000000e+00> : vector<128xf32>
    %41 = vector.multi_reduction <add>, %38, %cst_17 [1] : vector<128x128xf32> to vector<128xf32>
    %42 = vector.shape_cast %41 : vector<128xf32> to vector<128x1xf32>
    %43 = arith.addf %40, %42 : vector<128x1xf32>
    %c0_18 = arith.constant 0 : index
    %c0_19 = arith.constant 0 : index
    %44 = vector.load %arg8[%c0_18, %c0_19] : memref<128x1xf32, #tpu.memory_space<vmem>>, vector<128x1xf32>
    tpu.vector_store %arg8[%c0_18, %c0_19], %43 {strides = array<i32>} : memref<128x1xf32, #tpu.memory_space<vmem>>, vector<128x1xf32>,
    %c0_20 = arith.constant 0 : index
    %c0_21 = arith.constant 0 : index
    %45 = vector.load %arg7[%c0_20, %c0_21] : memref<128x1xf32, #tpu.memory_space<vmem>>, vector<128x1xf32>
    tpu.vector_store %arg7[%c0_20, %c0_21], %31 {strides = array<i32>} : memref<128x1xf32, #tpu.memory_space<vmem>>, vector<128x1xf32>,
    %c0_22 = arith.constant 0 : index
    %c0_23 = arith.constant 0 : index
    %46 = vector.load %arg9[%c0_22, %c0_23] : memref<128x1xf32, #tpu.memory_space<vmem>>, vector<128x1xf32>
    %cst_24 = arith.constant 0.000000e+00 : f32
    %47 = vector.broadcast %cst_24 : f32 to vector<128x128xf32>
    %48 = arith.select %25, %7, %47 : vector<128x128xi1>, vector<128x128xf32>
    %cst_25 = arith.constant dense<0.000000e+00> : vector<128xf32>
    %49 = vector.multi_reduction <add>, %48, %cst_25 [1] : vector<128x128xf32> to vector<128xf32>
    %50 = vector.shape_cast %49 : vector<128xf32> to vector<128x1xf32>
    %51 = arith.addf %46, %50 : vector<128x1xf32>
    %c0_26 = arith.constant 0 : index
    %c0_27 = arith.constant 0 : index
    %52 = vector.load %arg9[%c0_26, %c0_27] : memref<128x1xf32, #tpu.memory_space<vmem>>, vector<128x1xf32>
    tpu.vector_store %arg9[%c0_26, %c0_27], %51 {strides = array<i32>} : memref<128x1xf32, #tpu.memory_space<vmem>>, vector<128x1xf32>,
    %c0_28 = arith.constant 0 : index
    %c0_29 = arith.constant 0 : index
    %53 = vector.load %arg10[%c0_28, %c0_29] : memref<128x1xf32, #tpu.memory_space<vmem>>, vector<128x1xf32>
    %54 = arith.extui %25 : vector<128x128xi1> to vector<128x128xi32>
    %55 = arith.sitofp %54 : vector<128x128xi32> to vector<128x128xf32>
    %cst_30 = arith.constant dense<0.000000e+00> : vector<128xf32>
    %56 = vector.multi_reduction <add>, %55, %cst_30 [1] : vector<128x128xf32> to vector<128xf32>
    %57 = vector.shape_cast %56 : vector<128xf32> to vector<128x1xf32>
    %58 = arith.addf %53, %57 : vector<128x1xf32>
    %c0_31 = arith.constant 0 : index
    %c0_32 = arith.constant 0 : index
    %59 = vector.load %arg10[%c0_31, %c0_32] : memref<128x1xf32, #tpu.memory_space<vmem>>, vector<128x1xf32>
    tpu.vector_store %arg10[%c0_31, %c0_32], %58 {strides = array<i32>} : memref<128x1xf32, #tpu.memory_space<vmem>>, vector<128x1xf32>,
    %c0_i32_33 = arith.constant 0 : i32
    %60 = arith.cmpi eq, %arg1, %c0_i32_33 : i32
    %61 = arith.extui %60 : i1 to i32
    %c0_i32_34 = arith.constant 0 : i32
    %62 = arith.cmpi ne, %61, %c0_i32_34 : i32
    scf.if %62 {
      %c0_35 = arith.constant 0 : index
      %c0_36 = arith.constant 0 : index
      %63 = vector.load %arg10[%c0_35, %c0_36] : memref<128x1xf32, #tpu.memory_space<vmem>>, vector<128x1xf32>
      %cst_37 = arith.constant 1.000000e+00 : f32
      %64 = vector.broadcast %cst_37 : f32 to vector<128x1xf32>
      %65 = arith.maximumf %63, %64 : vector<128x1xf32>
      %c0_38 = arith.constant 0 : index
      %c0_39 = arith.constant 0 : index
      %66 = vector.load %arg9[%c0_38, %c0_39] : memref<128x1xf32, #tpu.memory_space<vmem>>, vector<128x1xf32>
      %c0_40 = arith.constant 0 : index
      %c0_41 = arith.constant 0 : index
      %67 = vector.load %arg7[%c0_40, %c0_41] : memref<128x1xf32, #tpu.memory_space<vmem>>, vector<128x1xf32>
      %68 = arith.mulf %63, %67 : vector<128x1xf32>
      %69 = arith.subf %66, %68 : vector<128x1xf32>
      %70 = arith.divf %69, %65 : vector<128x1xf32>
      %c0_42 = arith.constant 0 : index
      %c0_43 = arith.constant 0 : index
      %71 = vector.load %arg8[%c0_42, %c0_43] : memref<128x1xf32, #tpu.memory_space<vmem>>, vector<128x1xf32>
      %72 = math.log %71 : vector<128x1xf32>
      %73 = arith.subf %70, %72 : vector<128x1xf32>
      %cst_44 = arith.constant 0.000000e+00 : f32
      %74 = vector.broadcast %cst_44 : f32 to vector<128x1xf32>
      %75 = arith.cmpf ogt, %63, %74 : vector<128x1xf32>
      %cst_45 = arith.constant -1.000000e+00 : f32
      %76 = vector.broadcast %cst_45 : f32 to vector<128x1xf32>
      %77 = arith.mulf %76, %73 : vector<128x1xf32>
      %cst_46 = arith.constant 0.000000e+00 : f32
      %78 = vector.broadcast %cst_46 : f32 to vector<128x1xf32>
      %79 = arith.select %75, %77, %78 : vector<128x1xi1>, vector<128x1xf32>
      %c0_47 = arith.constant 0 : index
      %c0_48 = arith.constant 0 : index
      %80 = vector.load %arg6[%c0_47, %c0_48] : memref<128x1xf32, #tpu.memory_space<vmem>>, vector<128x1xf32>
      tpu.vector_store %arg6[%c0_47, %c0_48], %79 {strides = array<i32>} : memref<128x1xf32, #tpu.memory_space<vmem>>, vector<128x1xf32>,
    } else {
    }
    return
  }
  func.func @transform_0(%arg0: i32, %arg1: i32) -> (i32, i32) {
    %c0_i32 = arith.constant 0 : i32
    %c0_i32_0 = arith.constant 0 : i32
    return %arg0, %c0_i32 : i32, i32
  }
  func.func @transform_1(%arg0: i32, %arg1: i32) -> (i32, i32) {
    %c0_i32 = arith.constant 0 : i32
    %c0_i32_0 = arith.constant 0 : i32
    return %arg1, %c0_i32 : i32, i32
  }
  func.func @transform_2(%arg0: i32, %arg1: i32) -> (i32, i32) {
    %c0_i32 = arith.constant 0 : i32
    %c0_i32_0 = arith.constant 0 : i32
    return %arg0, %c0_i32 : i32, i32
  }
  func.func @transform_3(%arg0: i32, %arg1: i32) -> (i32, i32) {
    %c0_i32 = arith.constant 0 : i32
    %c0_i32_0 = arith.constant 0 : i32
    return %c0_i32, %arg1 : i32, i32
  }
  func.func @transform_4(%arg0: i32, %arg1: i32) -> (i32, i32) {
    %c0_i32 = arith.constant 0 : i32
    %c0_i32_0 = arith.constant 0 : i32
    return %arg0, %c0_i32 : i32, i32
  }
}

</mosaic_0001>

<bundles_post_ra>
// kernel: tile.9
= control target key start
LH: loop header
LB: loop body
LE: loop exit
PB: predicated region body
PF: predicated region fallthrough
CT: control target
= control target key end

     0   :  { %vm8_vm0 = vcmask 64512   ;;  %vm14_vm1 = vcmask 130112   ;;  %s42_s0 = inlined_call_operand.vmem [shape: s32[2,8], index: 0, kind: input, shape index: {}]   ;;  %s43_s1 = inlined_call_operand.vmem [shape: s32[16], index: 1, kind: output, shape index: {}]  }
   0x1   :  { %v5_v0 = vld [vmem:[%s42_s0] sm:$0x3]  ;;  %s25_s0 = smov 8  }
   0x2   :  { %6 = vst [vmem:[#allocation1] sm:$0x3] %v5_v0 }
   0x9   :  { %v11_v1 = vld [vmem:[#allocation1 + $0x1] sm:$0x1]   ;;  %v7_v2 = vld [vmem:[#allocation1] sm:$0x1]  }
   0xa   :  { %12 = vrot.lane.b32.xlu0 %v11_v1, %s25_s0  ;;  %9 = vst.msk [vmem:[#allocation0] sm:$0x1] %vm8_vm0, %v7_v2  }
  0x7c   :  { %v13_v3 = vpop.permute.xlu0 %12  }
  0x7d   :  { %15 = vst.msk [vmem:[#allocation0] sm:$0x1] %vm14_vm1, %v13_v3  }
  0x84   :  { %v20_v4 = vld [vmem:[#allocation0] sm:$0x1] }
  0x85   :  { %23 = vst [vmem:[%s43_s1] sm:$0x1] %v20_v4 }

// kernel: tile.8
= control target key start
LH: loop header
LB: loop body
LE: loop exit
PB: predicated region body
PF: predicated region fallthrough
CT: control target
= control target key end

     0   :  { %s22_s0 = inlined_call_operand.vmem [shape: s32[8], index: 0, kind: input, shape index: {}]   ;;  %s23_s1 = inlined_call_operand.vmem [shape: s32[2,8], index: 1, kind: output, shape index: {}]  }
   0x1   :  { %v4_v0 = vld [vmem:[%s22_s0] ss:$0 sm:$0xff] }
   0x2   :  { %5 = vst [vmem:[%s23_s1] sm:$0x3] %v4_v0 }

// kernel: _supcon_forward.1
= control target key start
LH: loop header
LB: loop body
LE: loop exit
PB: predicated region body
PF: predicated region fallthrough
CT: control target
= control target key end

     0   :  { %vm134_vm0 = vcmask 261120   ;;  %v1708_v2 = vmov 0   ;;  %v377_v59 = vlaneseq  ;;  %s2959_s1 = inlined_call_operand.vmem [shape: f32[128,32], index: 1, kind: input, shape index: {}, may-alias: {0,1}]   ;;  %s2960_s0 = inlined_call_operand.vmem [shape: f32[128,32], index: 0, kind: input, shape index: {}, may-alias: {0,1}]   ;;  %s2961_s2 = inlined_call_operand.vmem [shape: s32[128,1], index: 2, kind: input, shape index: {}]   ;;  %s2962_s3 = inlined_call_operand.vmem [shape: s32[1,128], index: 3, kind: input, shape index: {}]   ;;  %s2963_s4 = inlined_call_operand.vmem [shape: f32[128,1], index: 4, kind: output, shape index: {}]  }
   0x1   :  { %v133_v0 = vld [vmem:[%s2959_s1 + $0x78] sm:$0xff]  ;;  %v132_v1 = vld [vmem:[%s2959_s1 + $0x70] sm:$0xff]  ;;  %1579 = vset.pattern.permute.xlu1 %v1708_v2  ;;  %1578 = vset.pattern.permute.xlu0 %v1708_v2  ;;  %v131_v3 = vld [vmem:[%s2959_s1 + $0x68] sm:$0xff]  ;;  %v3011_v2 = vmov 0 }
   0x2   :  { %1487 = vmatprep.subr.msk.mxu0 %vm134_vm0, %v133_v0  ;;  %1543 = vmatprep.subr.msk.mxu1 %vm134_vm0, %v133_v0  ;;  %v86_v4 = vld [vmem:[%s2960_s0] sm:$0xff]  ;;  %v129_v9 = vld [vmem:[%s2959_s1 + $0x58] sm:$0xff]  ;;  %v451_v10 = vld [vmem:[%s2961_s2 + $0x10] sm:$0xff]  ;;  %v1942_v60 = vshrl.u32 %v377_v59, 7  ;;  %v1944_v61 = vand.u32 127, %v377_v59 }
   0x3   :  { %1488 = vmatpush3.xpose.msk.msra.mxu0 %vm134_vm0, %v133_v0  ;;  %1559 = vmatpush3.xpose.msk.msra.mxu1 %vm134_vm0, %v133_v0  ;;  %v94_v5 = vld [vmem:[%s2960_s0 + $0x40] sm:$0xff]  ;;  %v102_v6 = vmul.f32 14.285714, %v86_v4  ;;  %v128_v12 = vld [vmem:[%s2959_s1 + $0x50] sm:$0xff]  ;;  %v452_v13 = vld [vmem:[%s2961_s2 + $0x18] sm:$0xff] }
   0x4   :  { %1489 = vmatprep.subr.msk.mxu0 %vm134_vm0, %v132_v1  ;;  %1544 = vmatprep.subr.msk.mxu1 %vm134_vm0, %v132_v1  ;;  %v110_v7 = vmul.f32 14.285714, %v94_v5  ;;  %v130_v8 = vld [vmem:[%s2959_s1 + $0x60] sm:$0xff]  ;;  %v450_v14 = vld [vmem:[%s2961_s2 + $0x8] sm:$0xff]  ;;  %v456_v19 = vld [vmem:[%s2961_s2 + $0x38] sm:$0xff]  ;;  %v380_v62 = vadd.s32 16, %v1942_v60  ;;  %vm416_vm1 = vcmp.ne.s32.totalorder %v1942_v60, %v1944_v61 }
   0x5   :  { %1519 = vmatprep.mubr.msk.f32.mxu0 %vm134_vm0, %v102_v6  ;;  %v449_v11 = vld [vmem:[%s2961_s2] sm:$0xff]  ;;  %473 = vperm.xlu1 %1579, %v451_v10   ;;  %v127_v15 = vld [vmem:[%s2959_s1 + $0x48] sm:$0xff]  ;;  %v125_v20 = vld [vmem:[%s2959_s1 + $0x38] sm:$0xff]  ;;  %vm432_vm2 = vcmp.lt.s32.totalorder %v1944_v61, 16  ;;  %v379_v63 = vadd.s32 8, %v1942_v60  ;;  %v381_v0 = vadd.s32 24, %v1942_v60 }
   0x6   :  { %1531 = vmatprep.mubr.msk.f32.mxu1 %vm134_vm0, %v110_v7  ;;  %467 = vperm.xlu0 %1578, %v449_v11   ;;  %v454_v16 = vld [vmem:[%s2961_s2 + $0x28] sm:$0xff]  ;;  %v453_v17 = vld [vmem:[%s2961_s2 + $0x20] sm:$0xff]  ;;  %v124_v22 = vld [vmem:[%s2959_s1 + $0x30] sm:$0xff]  ;;  %vm418_vm3 = vcmp.ne.s32.totalorder %v380_v62, %v1944_v61  ;;  %v3013_v5 = vmov 0  ;;  %v3015_v6 = vmov 0  ;;  %v2975_v7 = vmov 0.0  }
   0x7   :  { %1490 = vmatpush3.xpose.msk.msra.mxu0 %vm134_vm0, %v132_v1  ;;  %1560 = vmatpush3.xpose.msk.msra.mxu1 %vm134_vm0, %v132_v1  ;;  %v126_v18 = vld [vmem:[%s2959_s1 + $0x40] sm:$0xff]  ;;  %v458_v21 = vld [vmem:[%s2961_s2 + $0x48] sm:$0xff]  ;;  %v460_v23 = vld [vmem:[%s2961_s2 + $0x58] sm:$0xff]  ;;  %vm417_vm5 = vcmp.ne.s32.totalorder %v379_v63, %v1944_v61  ;;  %vm419_vm7 = vcmp.ne.s32.totalorder %v381_v0, %v1944_v61  ;;  %v3037_v62 = vmov 0 }
   0x8   :  { %1491 = vmatprep.subr.msk.mxu0 %vm134_vm0, %v131_v3  ;;  %1545 = vmatprep.subr.msk.mxu1 %vm134_vm0, %v131_v3  ;;  %v123_v24 = vld [vmem:[%s2959_s1 + $0x28] sm:$0xff]  ;;  %v461_v25 = vld [vmem:[%s2961_s2 + $0x60] sm:$0xff]  ;;  %v121_v27 = vld [vmem:[%s2959_s1 + $0x18] sm:$0xff] }
   0x9   :  { %476 = vperm.xlu1 %1579, %v452_v13   ;;  %v122_v26 = vld [vmem:[%s2959_s1 + $0x20] sm:$0xff]  ;;  %v120_v28 = vld [vmem:[%s2959_s1 + $0x10] sm:$0xff]  ;;  %v119_v29 = vld [vmem:[%s2959_s1 + $0x8] sm:$0xff]  ;;  %v3021_v13 = vmov 0 }
   0xa   :  { %470 = vperm.xlu0 %1578, %v450_v14   ;;  %v118_v30 = vld [vmem:[%s2959_s1] sm:$0xff]  ;;  %v87_v31 = vld [vmem:[%s2960_s0 + $0x8] sm:$0xff]  ;;  %v88_v33 = vld [vmem:[%s2960_s0 + $0x10] sm:$0xff]  ;;  %v3023_v14 = vmov 0 }
   0xb   :  { %1492 = vmatpush3.xpose.msk.msra.mxu0 %vm134_vm0, %v131_v3  ;;  %1561 = vmatpush3.xpose.msk.msra.mxu1 %vm134_vm0, %v131_v3  ;;  %v95_v32 = vld [vmem:[%s2960_s0 + $0x48] sm:$0xff]  ;;  %v96_v34 = vld [vmem:[%s2960_s0 + $0x50] sm:$0xff]  ;;  %v103_v35 = vmul.f32 14.285714, %v87_v31  ;;  %v104_v37 = vmul.f32 14.285714, %v88_v33  ;;  %vm1960_vm4 = vmand %vm416_vm1, %vm432_vm2 }
   0xc   :  { %1493 = vmatprep.subr.msk.mxu0 %vm134_vm0, %v130_v8  ;;  %1546 = vmatprep.subr.msk.mxu1 %vm134_vm0, %v130_v8  ;;  %v111_v36 = vmul.f32 14.285714, %v95_v32  ;;  %v112_v38 = vmul.f32 14.285714, %v96_v34  ;;  %v89_v39 = vld [vmem:[%s2960_s0 + $0x18] sm:$0xff]  ;;  %v90_v41 = vld [vmem:[%s2960_s0 + $0x20] sm:$0xff]  ;;  %vm1969_vm8 = vmand %vm418_vm3, %vm432_vm2 }
   0xd   :  { %482 = vperm.xlu1 %1579, %v454_v16   ;;  %v97_v40 = vld [vmem:[%s2960_s0 + $0x58] sm:$0xff]  ;;  %v98_v42 = vld [vmem:[%s2960_s0 + $0x60] sm:$0xff]  ;;  %v105_v43 = vmul.f32 14.285714, %v89_v39  ;;  %v106_v45 = vmul.f32 14.285714, %v90_v41  ;;  %vm1985_vm11 = vmand %vm417_vm5, %vm432_vm2 }
   0xe   :  { %479 = vperm.xlu0 %1578, %v453_v17   ;;  %v113_v44 = vmul.f32 14.285714, %v97_v40  ;;  %v114_v46 = vmul.f32 14.285714, %v98_v42  ;;  %v91_v47 = vld [vmem:[%s2960_s0 + $0x28] sm:$0xff]  ;;  %v92_v49 = vld [vmem:[%s2960_s0 + $0x30] sm:$0xff]  ;;  %vm1991_vm12 = vmand %vm419_vm7, %vm432_vm2 }
   0xf   :  { %1494 = vmatpush3.xpose.msk.msra.mxu0 %vm134_vm0, %v130_v8  ;;  %1562 = vmatpush3.xpose.msk.msra.mxu1 %vm134_vm0, %v130_v8  ;;  %v99_v48 = vld [vmem:[%s2960_s0 + $0x68] sm:$0xff]  ;;  %v100_v50 = vld [vmem:[%s2960_s0 + $0x70] sm:$0xff]  ;;  %v107_v51 = vmul.f32 14.285714, %v91_v47  ;;  %v108_v53 = vmul.f32 14.285714, %v92_v49 }
  0x10   :  { %1495 = vmatprep.subr.msk.mxu0 %vm134_vm0, %v129_v9  ;;  %1547 = vmatprep.subr.msk.mxu1 %vm134_vm0, %v129_v9  ;;  %v115_v52 = vmul.f32 14.285714, %v99_v48  ;;  %v93_v54 = vld [vmem:[%s2960_s0 + $0x38] sm:$0xff]  ;;  %v116_v55 = vmul.f32 14.285714, %v100_v50  ;;  %v3012_v2 = vsel %vm1960_vm4, 4294967295, %v3011_v2 }
  0x11   :  { %488 = vperm.xlu1 %1579, %v456_v19   ;;  %v101_v56 = vld [vmem:[%s2960_s0 + $0x78] sm:$0xff]  ;;  %v109_v57 = vmul.f32 14.285714, %v93_v54  ;;  %v1955_v1 = vld [vmem:[%s2962_s3] ss:$0 sm:$0xff]  ;;  %v3014_v5 = vsel %vm1969_vm8, 4294967295, %v3013_v5 }
  0x12   :  { %v117_v58 = vmul.f32 14.285714, %v101_v56  ;;  %v3025_v16 = vmov 0  ;;  %vm2964_vm3 = vcmask 7168   ;;  %v1710_v19 = vmov -1e+30  }
  0x13   :  { %1496 = vmatpush3.xpose.msk.msra.mxu0 %vm134_vm0, %v129_v9  ;;  %1563 = vmatpush3.xpose.msk.msra.mxu1 %vm134_vm0, %v129_v9  ;;  %v3017_v9 = vmov 0  ;;  %70 = vst.msk [vmem:[#allocation5] sm:$0xff] %vm2964_vm3, %v2975_v7  ;;  %38 = vst.msk [vmem:[#allocation3] sm:$0xff] %vm2964_vm3, %v2975_v7  ;;  %v3029_v32 = vmov 0  ;;  %v382_v33 = vadd.s32 32, %v1942_v60  ;;  %v389_v34 = vadd.s32 88, %v1942_v60 }
  0x14   :  { %1497 = vmatprep.subr.msk.mxu0 %vm134_vm0, %v128_v12  ;;  %1548 = vmatprep.subr.msk.mxu1 %vm134_vm0, %v128_v12  ;;  %v3018_v9 = vsel %vm1985_vm11, 4294967295, %v3017_v9  ;;  %39 = vst.msk [vmem:[#allocation3 + $0x8] sm:$0xff] %vm2964_vm3, %v2975_v7  ;;  %40 = vst.msk [vmem:[#allocation3 + $0x10] sm:$0xff] %vm2964_vm3, %v2975_v7  ;;  %v3033_v47 = vmov 0  ;;  %v384_v48 = vadd.s32 48, %v1942_v60  ;;  %v383_v54 = vadd.s32 40, %v1942_v60 }
  0x15   :  { %494 = vperm.xlu1 %1579, %v458_v21   ;;  %41 = vst.msk [vmem:[#allocation3 + $0x18] sm:$0xff] %vm2964_vm3, %v2975_v7  ;;  %42 = vst.msk [vmem:[#allocation3 + $0x20] sm:$0xff] %vm2964_vm3, %v2975_v7 }
  0x16   :  { %43 = vst.msk [vmem:[#allocation3 + $0x28] sm:$0xff] %vm2964_vm3, %v2975_v7  ;;  %44 = vst.msk [vmem:[#allocation3 + $0x30] sm:$0xff] %vm2964_vm3, %v2975_v7 }
  0x17   :  { %1498 = vmatpush3.xpose.msk.msra.mxu0 %vm134_vm0, %v128_v12  ;;  %1564 = vmatpush3.xpose.msk.msra.mxu1 %vm134_vm0, %v128_v12  ;;  %v3019_v12 = vmov 0  ;;  %45 = vst.msk [vmem:[#allocation3 + $0x38] sm:$0xff] %vm2964_vm3, %v2975_v7  ;;  %46 = vst.msk [vmem:[#allocation3 + $0x40] sm:$0xff] %vm2964_vm3, %v2975_v7 }
  0x18   :  { %1499 = vmatprep.subr.msk.mxu0 %vm134_vm0, %v127_v15  ;;  %1549 = vmatprep.subr.msk.mxu1 %vm134_vm0, %v127_v15  ;;  %v3020_v12 = vsel %vm1991_vm12, 4294967295, %v3019_v12  ;;  %47 = vst.msk [vmem:[#allocation3 + $0x48] sm:$0xff] %vm2964_vm3, %v2975_v7  ;;  %48 = vst.msk [vmem:[#allocation3 + $0x50] sm:$0xff] %vm2964_vm3, %v2975_v7 }
  0x19   :  { %500 = vperm.xlu1 %1579, %v460_v23   ;;  %49 = vst.msk [vmem:[#allocation3 + $0x58] sm:$0xff] %vm2964_vm3, %v2975_v7  ;;  %50 = vst.msk [vmem:[#allocation3 + $0x60] sm:$0xff] %vm2964_vm3, %v2975_v7  ;;  %v388_v23 = vadd.s32 80, %v1942_v60 }
  0x1a   :  { %51 = vst.msk [vmem:[#allocation3 + $0x68] sm:$0xff] %vm2964_vm3, %v2975_v7  ;;  %52 = vst.msk [vmem:[#allocation3 + $0x70] sm:$0xff] %vm2964_vm3, %v2975_v7 }
  0x1b   :  { %1500 = vmatpush3.xpose.msk.msra.mxu0 %vm134_vm0, %v127_v15  ;;  %1565 = vmatpush3.xpose.msk.msra.mxu1 %vm134_vm0, %v127_v15  ;;  %53 = vst.msk [vmem:[#allocation3 + $0x78] sm:$0xff] %vm2964_vm3, %v2975_v7  ;;  %54 = vst.msk [vmem:[#allocation4] sm:$0xff] %vm2964_vm3, %v2975_v7 }
  0x1c   :  { %1501 = vmatprep.subr.msk.mxu0 %vm134_vm0, %v126_v18  ;;  %1550 = vmatprep.subr.msk.mxu1 %vm134_vm0, %v126_v18  ;;  %55 = vst.msk [vmem:[#allocation4 + $0x8] sm:$0xff] %vm2964_vm3, %v2975_v7  ;;  %56 = vst.msk [vmem:[#allocation4 + $0x10] sm:$0xff] %vm2964_vm3, %v2975_v7 }
  0x1d   :  { %503 = vperm.xlu1 %1579, %v461_v25   ;;  %57 = vst.msk [vmem:[#allocation4 + $0x18] sm:$0xff] %vm2964_vm3, %v2975_v7  ;;  %58 = vst.msk [vmem:[#allocation4 + $0x20] sm:$0xff] %vm2964_vm3, %v2975_v7 }
  0x1e   :  { %59 = vst.msk [vmem:[#allocation4 + $0x28] sm:$0xff] %vm2964_vm3, %v2975_v7  ;;  %60 = vst.msk [vmem:[#allocation4 + $0x30] sm:$0xff] %vm2964_vm3, %v2975_v7 }
  0x1f   :  { %1502 = vmatpush3.xpose.msk.msra.mxu0 %vm134_vm0, %v126_v18  ;;  %1566 = vmatpush3.xpose.msk.msra.mxu1 %vm134_vm0, %v126_v18  ;;  %61 = vst.msk [vmem:[#allocation4 + $0x38] sm:$0xff] %vm2964_vm3, %v2975_v7  ;;  %62 = vst.msk [vmem:[#allocation4 + $0x40] sm:$0xff] %vm2964_vm3, %v2975_v7 }
  0x20   :  { %1503 = vmatprep.subr.msk.mxu0 %vm134_vm0, %v125_v20  ;;  %1551 = vmatprep.subr.msk.mxu1 %vm134_vm0, %v125_v20  ;;  %63 = vst.msk [vmem:[#allocation4 + $0x48] sm:$0xff] %vm2964_vm3, %v2975_v7  ;;  %64 = vst.msk [vmem:[#allocation4 + $0x50] sm:$0xff] %vm2964_vm3, %v2975_v7 }
  0x21   :  { %65 = vst.msk [vmem:[#allocation4 + $0x58] sm:$0xff] %vm2964_vm3, %v2975_v7  ;;  %66 = vst.msk [vmem:[#allocation4 + $0x60] sm:$0xff] %vm2964_vm3, %v2975_v7 }
  0x22   :  { %67 = vst.msk [vmem:[#allocation4 + $0x68] sm:$0xff] %vm2964_vm3, %v2975_v7  ;;  %68 = vst.msk [vmem:[#allocation4 + $0x70] sm:$0xff] %vm2964_vm3, %v2975_v7 }
  0x23   :  { %1504 = vmatpush3.xpose.msk.msra.mxu0 %vm134_vm0, %v125_v20  ;;  %1567 = vmatpush3.xpose.msk.msra.mxu1 %vm134_vm0, %v125_v20  ;;  %69 = vst.msk [vmem:[#allocation4 + $0x78] sm:$0xff] %vm2964_vm3, %v2975_v7  ;;  %71 = vst.msk [vmem:[#allocation5 + $0x8] sm:$0xff] %vm2964_vm3, %v2975_v7  ;;  %v387_v20 = vadd.s32 72, %v1942_v60 }
  0x24   :  { %1505 = vmatprep.subr.msk.mxu0 %vm134_vm0, %v124_v22  ;;  %1552 = vmatprep.subr.msk.mxu1 %vm134_vm0, %v124_v22  ;;  %72 = vst.msk [vmem:[#allocation5 + $0x10] sm:$0xff] %vm2964_vm3, %v2975_v7  ;;  %73 = vst.msk [vmem:[#allocation5 + $0x18] sm:$0xff] %vm2964_vm3, %v2975_v7 }
  0x25   :  { %74 = vst.msk [vmem:[#allocation5 + $0x20] sm:$0xff] %vm2964_vm3, %v2975_v7  ;;  %75 = vst.msk [vmem:[#allocation5 + $0x28] sm:$0xff] %vm2964_vm3, %v2975_v7  ;;  %vm425_vm5 = vcmp.ne.s32.totalorder %v387_v20, %v1944_v61 }
  0x26   :  { %76 = vst.msk [vmem:[#allocation5 + $0x30] sm:$0xff] %vm2964_vm3, %v2975_v7  ;;  %77 = vst.msk [vmem:[#allocation5 + $0x38] sm:$0xff] %vm2964_vm3, %v2975_v7 }
  0x27   :  { %1506 = vmatpush3.xpose.msk.msra.mxu0 %vm134_vm0, %v124_v22  ;;  %1568 = vmatpush3.xpose.msk.msra.mxu1 %vm134_vm0, %v124_v22  ;;  %78 = vst.msk [vmem:[#allocation5 + $0x40] sm:$0xff] %vm2964_vm3, %v2975_v7  ;;  %79 = vst.msk [vmem:[#allocation5 + $0x48] sm:$0xff] %vm2964_vm3, %v2975_v7  ;;  %v386_v22 = vadd.s32 64, %v1942_v60 }
  0x28   :  { %1507 = vmatprep.subr.msk.mxu0 %vm134_vm0, %v123_v24  ;;  %1553 = vmatprep.subr.msk.mxu1 %vm134_vm0, %v123_v24  ;;  %80 = vst.msk [vmem:[#allocation5 + $0x50] sm:$0xff] %vm2964_vm3, %v2975_v7  ;;  %81 = vst.msk [vmem:[#allocation5 + $0x58] sm:$0xff] %vm2964_vm3, %v2975_v7 }
  0x29   :  { %82 = vst.msk [vmem:[#allocation5 + $0x60] sm:$0xff] %vm2964_vm3, %v2975_v7  ;;  %83 = vst.msk [vmem:[#allocation5 + $0x68] sm:$0xff] %vm2964_vm3, %v2975_v7 }
  0x2a   :  { %84 = vst.msk [vmem:[#allocation5 + $0x70] sm:$0xff] %vm2964_vm3, %v2975_v7  ;;  %85 = vst.msk [vmem:[#allocation5 + $0x78] sm:$0xff] %vm2964_vm3, %v2975_v7 }
  0x2b   :  { %1508 = vmatpush3.xpose.msk.msra.mxu0 %vm134_vm0, %v123_v24  ;;  %1569 = vmatpush3.xpose.msk.msra.mxu1 %vm134_vm0, %v123_v24  ;;  %31 = vst.msk [vmem:[#allocation2 + $0x48] sm:$0xff] %vm2964_vm3, %v1710_v19  ;;  %22 = vst.msk [vmem:[#allocation2] sm:$0xff] %vm2964_vm3, %v1710_v19 }
  0x2c   :  { %1509 = vmatprep.subr.msk.mxu0 %vm134_vm0, %v122_v26  ;;  %1554 = vmatprep.subr.msk.mxu1 %vm134_vm0, %v122_v26  ;;  %23 = vst.msk [vmem:[#allocation2 + $0x8] sm:$0xff] %vm2964_vm3, %v1710_v19  ;;  %24 = vst.msk [vmem:[#allocation2 + $0x10] sm:$0xff] %vm2964_vm3, %v1710_v19 }
  0x2d   :  { %25 = vst.msk [vmem:[#allocation2 + $0x18] sm:$0xff] %vm2964_vm3, %v1710_v19  ;;  %26 = vst.msk [vmem:[#allocation2 + $0x20] sm:$0xff] %vm2964_vm3, %v1710_v19 }
  0x2e   :  { %27 = vst.msk [vmem:[#allocation2 + $0x28] sm:$0xff] %vm2964_vm3, %v1710_v19  ;;  %28 = vst.msk [vmem:[#allocation2 + $0x30] sm:$0xff] %vm2964_vm3, %v1710_v19 }
  0x2f   :  { %1510 = vmatpush3.xpose.msk.msra.mxu0 %vm134_vm0, %v122_v26  ;;  %1570 = vmatpush3.xpose.msk.msra.mxu1 %vm134_vm0, %v122_v26  ;;  %29 = vst.msk [vmem:[#allocation2 + $0x38] sm:$0xff] %vm2964_vm3, %v1710_v19  ;;  %30 = vst.msk [vmem:[#allocation2 + $0x40] sm:$0xff] %vm2964_vm3, %v1710_v19 }
  0x30   :  { %1511 = vmatprep.subr.msk.mxu0 %vm134_vm0, %v121_v27  ;;  %1555 = vmatprep.subr.msk.mxu1 %vm134_vm0, %v121_v27  ;;  %32 = vst.msk [vmem:[#allocation2 + $0x50] sm:$0xff] %vm2964_vm3, %v1710_v19  ;;  %33 = vst.msk [vmem:[#allocation2 + $0x58] sm:$0xff] %vm2964_vm3, %v1710_v19 }
  0x31   :  { %34 = vst.msk [vmem:[#allocation2 + $0x60] sm:$0xff] %vm2964_vm3, %v1710_v19  ;;  %35 = vst.msk [vmem:[#allocation2 + $0x68] sm:$0xff] %vm2964_vm3, %v1710_v19 }
  0x32   :  { %36 = vst.msk [vmem:[#allocation2 + $0x70] sm:$0xff] %vm2964_vm3, %v1710_v19  ;;  %37 = vst.msk [vmem:[#allocation2 + $0x78] sm:$0xff] %vm2964_vm3, %v1710_v19  ;;  %v385_v19 = vadd.s32 56, %v1942_v60 }
  0x33   :  { %1512 = vmatpush3.xpose.msk.msra.mxu0 %vm134_vm0, %v121_v27  ;;  %1571 = vmatpush3.xpose.msk.msra.mxu1 %vm134_vm0, %v121_v27  ;;  %vm2149_vm7 = vmand %vm425_vm5, %vm432_vm2  ;;  %vm420_vm5 = vcmp.ne.s32.totalorder %v382_v33, %v1944_v61 }
  0x34   :  { %1513 = vmatprep.subr.msk.mxu0 %vm134_vm0, %v120_v28  ;;  %1556 = vmatprep.subr.msk.mxu1 %vm134_vm0, %v120_v28 }
  0x37   :  { %1514 = vmatpush3.xpose.msk.msra.mxu0 %vm134_vm0, %v120_v28  ;;  %1572 = vmatpush3.xpose.msk.msra.mxu1 %vm134_vm0, %v120_v28 }
  0x38   :  { %1515 = vmatprep.subr.msk.mxu0 %vm134_vm0, %v119_v29  ;;  %1557 = vmatprep.subr.msk.mxu1 %vm134_vm0, %v119_v29 }
  0x3b   :  { %1516 = vmatpush3.xpose.msk.msra.mxu0 %vm134_vm0, %v119_v29  ;;  %1573 = vmatpush3.xpose.msk.msra.mxu1 %vm134_vm0, %v119_v29 }
  0x3c   :  { %1517 = vmatprep.subr.msk.mxu0 %vm134_vm0, %v118_v30  ;;  %1558 = vmatprep.subr.msk.mxu1 %vm134_vm0, %v118_v30 }
  0x3f   :  { %1518 = vmatpush3.xpose.msk.msra.mxu0 %vm134_vm0, %v118_v30  ;;  %1574 = vmatpush3.xpose.msk.msra.mxu1 %vm134_vm0, %v118_v30 }
  0x42   :  { %1520 = vmatmul.mubr.msk.f32.vlgmr.msra.gmra.mxu0 %vm134_vm0, %v103_v35  ;;  %1532 = vmatmul.mubr.msk.f32.vlgmr.msra.gmra.mxu1 %vm134_vm0, %v111_v36 }
  0x43   :  { %1522 = vmatprep.mubr.msk.f32.mxu0 %vm134_vm0, %v104_v37  ;;  %1534 = vmatprep.mubr.msk.f32.mxu1 %vm134_vm0, %v112_v38 }
  0x46   :  { %1523 = vmatmul.mubr.msk.f32.gmra.mxu0 %vm134_vm0, %v105_v43  ;;  %1535 = vmatmul.mubr.msk.f32.gmra.mxu1 %vm134_vm0, %v113_v44 }
  0x47   :  { %1525 = vmatprep.mubr.msk.f32.mxu0 %vm134_vm0, %v106_v45  ;;  %1537 = vmatprep.mubr.msk.f32.mxu1 %vm134_vm0, %v114_v46  ;;  %v390_v45 = vadd.s32 96, %v1942_v60 }
  0x4a   :  { %1526 = vmatmul.mubr.msk.f32.gmra.mxu0 %vm134_vm0, %v107_v51  ;;  %1538 = vmatmul.mubr.msk.f32.gmra.mxu1 %vm134_vm0, %v115_v52 }
  0x4b   :  { %1528 = vmatprep.mubr.msk.f32.mxu0 %vm134_vm0, %v108_v53  ;;  %1540 = vmatprep.mubr.msk.f32.mxu1 %vm134_vm0, %v116_v55  ;;  %v391_v55 = vadd.s32 104, %v1942_v60 }
  0x4e   :  { %1529 = vmatmul.mubr.msk.f32.gmra.mxu0 %vm134_vm0, %v109_v57  ;;  %1541 = vmatmul.mubr.msk.f32.gmra.mxu1 %vm134_vm0, %v117_v58  ;;  %v392_v57 = vadd.s32 112, %v1942_v60 }
  0x80   :  { %v474_v3 = vpop.permute.xlu1 %473 }
  0x81   :  { %v468_v4 = vpop.permute.xlu0 %467  ;;  %vm520_vm9 = vcmp.eq.s32.totalorder %v474_v3, %v1955_v1 }
  0x82   :  { %vm518_vm6 = vcmp.eq.s32.totalorder %v468_v4, %v1955_v1  ;;  %vm1999_vm15 = vmand %vm1969_vm8, %vm520_vm9  ;;  %vm426_vm9 = vcmp.ne.s32.totalorder %v388_v23, %v1944_v61  ;;  %v3039_v4 = vmov 0  ;;  %v393_v23 = vadd.s32 120, %v1942_v60 }
  0x83   :  { %vm1976_vm10 = vmand %vm1960_vm4, %vm518_vm6  ;;  %v3022_v13 = vsel %vm1999_vm15, 4294967295, %v3021_v13  ;;  %v1441_v18 = vsel %vm1999_vm15, 1.0, %v2975_v7  ;;  %vm424_vm6 = vcmp.ne.s32.totalorder %v386_v22, %v1944_v61  ;;  %vm430_vm15 = vcmp.ne.s32.totalorder %v392_v57, %v1944_v61  ;;  %v1033_v57 = vld [vmem:[#allocation5 + $0x10] sm:$0xff] }
  0x84   :  { %v3016_v6 = vsel %vm1976_vm10, 4294967295, %v3015_v6  ;;  %v1439_v8 = vsel %vm1976_vm10, 1.0, %v2975_v7  ;;  %v477_v10 = vpop.permute.xlu1 %476  ;;  %v3045_v22 = vmov 0  ;;  %v3047_v60 = vmov 0 }
  0x85   :  { %v471_v11 = vpop.permute.xlu0 %470  ;;  %1079 = vadd.xlane.f32.xlu1 %v1439_v8  ;;  %vm521_vm13 = vcmp.eq.s32.totalorder %v477_v10, %v1955_v1  ;;  %v3041_v10 = vmov 0 }
  0x86   :  { %vm519_vm14 = vcmp.eq.s32.totalorder %v471_v11, %v1955_v1  ;;  %vm2014_vm1 = vmand %vm1991_vm12, %vm521_vm13 }
  0x87   :  { %vm2005_vm0 = vmand %vm1985_vm11, %vm519_vm14  ;;  %v3026_v16 = vsel %vm2014_vm1, 4294967295, %v3025_v16  ;;  %v1442_v17 = vsel %vm2014_vm1, 1.0, %v2975_v7  ;;  %vm3049_vm1 = vcmask 7168  }
  0x88   :  { %v3024_v14 = vsel %vm2005_vm0, 4294967295, %v3023_v14  ;;  %v1440_v15 = vsel %vm2005_vm0, 1.0, %v2975_v7  ;;  %v2137_v21 = vpop.permute.xlu1 %482  ;;  %vm2168_vm13 = vmand %vm424_vm6, %vm432_vm2  ;;  %vm427_vm6 = vcmp.ne.s32.totalorder %v389_v34, %v1944_v61 }
  0x89   :  { %1081 = vadd.xlane.f32.xlu0 %v1440_v15  ;;  %1085 = vadd.xlane.f32.xlu1 %v1442_v17  ;;  %v3030_v32 = vsel %vm2168_vm13, 4294967295, %v3029_v32  ;;  %vm2180_vm14 = vmand %vm426_vm9, %vm432_vm2 }
  0x8a   :  { %vm2209_vm9 = vmand %vm420_vm5, %vm432_vm2  ;;  %vm428_vm5 = vcmp.ne.s32.totalorder %v390_v45, %v1944_v61 }
  0x8b   :  { %v3034_v47 = vsel %vm2209_vm9, 4294967295, %v3033_v47  ;;  %vm2220_vm3 = vmand %vm427_vm6, %vm432_vm2  ;;  %vm422_vm6 = vcmp.ne.s32.totalorder %v384_v48, %v1944_v61 }
  0x8c   :  { %v2153_v27 = vpop.permute.xlu1 %488 }
  0x8d   :  { %1083 = vadd.xlane.f32.xlu0 %v1441_v18  ;;  %v3043_v18 = vmov 0 }
  0x90   :  { %v2195_v42 = vpop.permute.xlu1 %494 }
  0x94   :  { %v2233_v56 = vpop.permute.xlu1 %500 }
  0x98   :  { %v2272_v11 = vpop.permute.xlu1 %503 }
 0x102   :  { %v2143_v24 = vpop.f32.mrf.mxu0  ;;  %v2145_v25 = vpop.f32.mrf.mxu1 }
 0x103   :  { %v559_v28 = vsel %vm2149_vm7, %v2145_v25, -1e+30  ;;  %v551_v29 = vsel %vm1985_vm11, %v2143_v24, -1e+30  ;;  %vm2257_vm11 = vmand %vm422_vm6, %vm432_vm2 }
 0x104   :  { %600 = vmax.xlane.f32.xlu0 %v559_v28  ;;  %v2162_v30 = vpop.f32.mrf.mxu1  ;;  %584 = vmax.xlane.f32.xlu1 %v551_v29  ;;  %v2164_v31 = vpop.f32.mrf.mxu0  ;;  %v3040_v4 = vsel %vm2257_vm11, 4294967295, %v3039_v4  ;;  %v1031_v28 = vld [vmem:[#allocation5] sm:$0xff] }
 0x105   :  { %v558_v38 = vsel %vm2168_vm13, %v2162_v30, -1e+30  ;;  %v550_v39 = vsel %vm1960_vm4, %v2164_v31, -1e+30  ;;  %vm421_vm4 = vcmp.ne.s32.totalorder %v383_v54, %v1944_v61  ;;  %v480_v29 = vpop.permute.xlu0 %479 }
 0x106   :  { %v2174_v35 = vpop.f32.mrf.mxu0  ;;  %v2176_v36 = vpop.f32.mrf.mxu1  ;;  %vm2268_vm10 = vmand %vm421_vm4, %vm432_vm2 }
 0x107   :  { %v553_v44 = vsel %vm1991_vm12, %v2174_v35, -1e+30  ;;  %v561_v52 = vsel %vm2220_vm3, %v2176_v36, -1e+30  ;;  %vm2243_vm12 = vmand %vm428_vm5, %vm432_vm2  ;;  %vm429_vm5 = vcmp.ne.s32.totalorder %v391_v55, %v1944_v61  ;;  %v3042_v10 = vsel %vm2268_vm10, 4294967295, %v3041_v10 }
 0x108   :  { %v2190_v40 = vpop.f32.mrf.mxu1  ;;  %598 = vmax.xlane.f32.xlu1 %v558_v38  ;;  %582 = vmax.xlane.f32.xlu0 %v550_v39  ;;  %v2192_v41 = vpop.f32.mrf.mxu0  ;;  %v3038_v62 = vsel %vm2243_vm12, 4294967295, %v3037_v62  ;;  %vm2282_vm6 = vmand %vm429_vm5, %vm432_vm2  ;;  %vm423_vm5 = vcmp.ne.s32.totalorder %v385_v19, %v1944_v61  ;;  %v464_v19 = vld [vmem:[%s2961_s2 + $0x78] sm:$0xff] }
 0x109   :  { %v560_v43 = vsel %vm2180_vm14, %v2190_v40, -1e+30  ;;  %v552_v8 = vsel %vm1969_vm8, %v2192_v41, -1e+30  ;;  %v3044_v18 = vsel %vm2282_vm6, 4294967295, %v3043_v18  ;;  %vm2291_vm4 = vmand %vm430_vm15, %vm432_vm2  ;;  %vm431_vm15 = vcmp.ne.s32.totalorder %v393_v23, %v1944_v61  ;;  %v455_v23 = vld [vmem:[%s2961_s2 + $0x30] sm:$0xff] }
 0x10a   :  { %v2205_v46 = vpop.f32.mrf.mxu0  ;;  %v2214_v49 = vpop.f32.mrf.mxu1  ;;  %v3046_v22 = vsel %vm2291_vm4, 4294967295, %v3045_v22  ;;  %vm2306_vm8 = vmand %vm423_vm5, %vm432_vm2 }
 0x10b   :  { %v555_v15 = vsel %vm2268_vm10, %v2205_v46, -1e+30  ;;  %v563_v33 = vsel %vm2282_vm6, %v2214_v49, -1e+30  ;;  %v3048_v60 = vsel %vm2306_vm8, 4294967295, %v3047_v60  ;;  %vm2316_vm6 = vmand %vm431_vm15, %vm432_vm2 }
 0x10c   :  { %602 = vmax.xlane.f32.xlu1 %v560_v43  ;;  %588 = vmax.xlane.f32.xlu0 %v553_v44  ;;  %v2216_v50 = vpop.f32.mrf.mxu0  ;;  %v2237_v58 = vpop.f32.mrf.mxu1  ;;  %v1032_v43 = vld [vmem:[#allocation5 + $0x8] sm:$0xff]  ;;  %v1034_v44 = vld [vmem:[#allocation5 + $0x18] sm:$0xff]  ;;  %vm3052_vm5 = vmmov %vm3049_vm1 }
 0x10d   :  { %v554_v53 = vsel %vm2209_vm9, %v2216_v50, -1e+30  ;;  %v562_v63 = vsel %vm2243_vm12, %v2237_v58, -1e+30  ;;  %vm3053_vm0 = vmmov %vm3052_vm5 }
 0x10e   :  { %v2239_v59 = vpop.f32.mrf.mxu0  ;;  %v2253_v3 = vpop.f32.mrf.mxu1  ;;  %vm3056_vm15 = vmmov %vm3053_vm0 }
 0x10f   :  { %v1080_v38 = vpop.xlane.xlu1 %1079  ;;  %v557_v45 = vsel %vm2306_vm8, %v2239_v59, -1e+30 }
 0x110   :  { %604 = vmax.xlane.f32.xlu0 %v561_v52  ;;  %590 = vmax.xlane.f32.xlu1 %v554_v53  ;;  %v2251_v0 = vpop.f32.mrf.mxu0  ;;  %v2287_v20 = vpop.f32.mrf.mxu1  ;;  %v1111_v39 = vadd.f32 %v1080_v38, %v1031_v28  ;;  %v457_v28 = vld [vmem:[%s2961_s2 + $0x40] sm:$0xff]  ;;  %v2354_v38 = vld [vmem:[#allocation2 + $0x48] sm:$0xff] }
 0x111   :  { %v556_v17 = vsel %vm2257_vm11, %v2251_v0, -1e+30  ;;  %v564_v34 = vsel %vm2291_vm4, %v2287_v20, -1e+30 }
 0x112   :  { %1127 = vst.msk [vmem:[#allocation5] sm:$0xff] %vm3049_vm1, %v1111_v39  ;;  %v1082_v48 = vpop.xlane.xlu0 %1081  ;;  %vm522_vm1 = vcmp.eq.s32.totalorder %v480_v29, %v1955_v1  ;;  %v459_v29 = vld [vmem:[%s2961_s2 + $0x50] sm:$0xff]  ;;  %v2356_v39 = vld [vmem:[#allocation2 + $0x8] sm:$0xff] }
 0x113   :  { %v1112_v53 = vadd.f32 %v1082_v48, %v1032_v43  ;;  %v1086_v54 = vpop.xlane.xlu1 %1085  ;;  %vm2328_vm2 = vmand %vm2209_vm9, %vm522_vm1 }
 0x114   :  { %586 = vmax.xlane.f32.xlu0 %v552_v8  ;;  %606 = vmax.xlane.f32.xlu1 %v562_v63  ;;  %v1114_v55 = vadd.f32 %v1086_v54, %v1034_v44  ;;  %v565_v63 = vsel %vm2316_vm6, %v2253_v3, -1e+30  ;;  %v2366_v54 = vld [vmem:[#allocation2] sm:$0xff]  ;;  %vm3062_vm1 = vmmov %vm3053_vm0 }
 0x115   :  { %1128 = vst.msk [vmem:[#allocation5 + $0x8] sm:$0xff] %vm3052_vm5, %v1112_v53  ;;  %v2364_v53 = vld [vmem:[#allocation2 + $0x40] sm:$0xff]  ;;  %3057 = vst [vmem:[#allocation6_spill] sm:$0xff] %v2366_v54 }
 0x116   :  { %1130 = vst.msk [vmem:[#allocation5 + $0x18] sm:$0xff] %vm3053_vm0, %v1114_v55  ;;  %v1084_v61 = vpop.xlane.xlu0 %1083  ;;  %vm3058_vm5 = vmmov %vm3053_vm0  ;;  %v2441_v55 = vld [vmem:[#allocation2 + $0x28] sm:$0xff] }
 0x117   :  { %v1113_v8 = vadd.f32 %v1084_v61, %v1033_v57  ;;  %3074 = vst [vmem:[#allocation17_spill] sm:$0xff] %v2441_v55 }
 0x118   :  { %592 = vmax.xlane.f32.xlu0 %v555_v15  ;;  %594 = vmax.xlane.f32.xlu1 %v556_v17  ;;  %v1443_v17 = vsel %vm2328_vm2, 1.0, %v2975_v7  ;;  %v2424_v7 = vld [vmem:[#allocation2 + $0x60] sm:$0xff] }
 0x119   :  { %1129 = vst.msk [vmem:[#allocation5 + $0x10] sm:$0xff] %vm3056_vm15, %v1113_v8  ;;  %vm3063_vm15 = vmmov %vm3053_vm0 }
 0x11a   :  { %3070 = vst [vmem:[#allocation15_spill] sm:$0xff] %v2424_v7 }
 0x11c   :  { %608 = vmax.xlane.f32.xlu0 %v563_v33  ;;  %610 = vmax.xlane.f32.xlu1 %v564_v34  ;;  %v462_v33 = vld [vmem:[%s2961_s2 + $0x68] sm:$0xff]  ;;  %v463_v34 = vld [vmem:[%s2961_s2 + $0x70] sm:$0xff] }
 0x120   :  { %596 = vmax.xlane.f32.xlu0 %v557_v45 }
 0x124   :  { %612 = vmax.xlane.f32.xlu0 %v565_v63 }
 0x128   :  { %1087 = vadd.xlane.f32.xlu0 %v1443_v17 }
 0x12d   :  { %512 = vperm.xlu1 %1579, %v464_v19   ;;  %v2383_v19 = vld [vmem:[#allocation2 + $0x50] sm:$0xff] }
 0x12e   :  { %3060 = vst [vmem:[#allocation8_spill] sm:$0xff] %v2383_v19 }
 0x13e   :  { %485 = vperm.xlu0 %1578, %v455_v23   ;;  %v2385_v23 = vld [vmem:[#allocation2 + $0x18] sm:$0xff] }
 0x13f   :  { %3061 = vst [vmem:[#allocation9_spill] sm:$0xff] %v2385_v23 }
 0x142   :  { %491 = vperm.xlu0 %1578, %v457_v28  }
 0x146   :  { %497 = vperm.xlu0 %1578, %v459_v29   ;;  %v2422_v29 = vld [vmem:[#allocation2 + $0x10] sm:$0xff] }
 0x147   :  { %3069 = vst [vmem:[#allocation14_spill] sm:$0xff] %v2422_v29 }
 0x14a   :  { %506 = vperm.xlu0 %1578, %v462_v33  }
 0x14e   :  { %509 = vperm.xlu0 %1578, %v463_v34  }
 0x18d   :  { %v601_v43 = vpop.xlane.xlu0 %600  ;;  %v585_v44 = vpop.xlane.xlu1 %584 }
 0x18e   :  { %v2359_v45 = vmax.f32 %v2354_v38, %v601_v43  ;;  %v2362_v48 = vmax.f32 %v2356_v39, %v585_v44 }
 0x190   :  { %928 = vst.msk [vmem:[#allocation2 + $0x48] sm:$0xff] %vm3053_vm0, %v2359_v45  ;;  %685 = vperm.xlu1 %1579, %v2362_v48  }
 0x191   :  { %920 = vst.msk [vmem:[#allocation2 + $0x8] sm:$0xff] %vm3058_vm5, %v2362_v48  ;;  %v599_v63 = vpop.xlane.xlu1 %598  ;;  %v583_v61 = vpop.xlane.xlu0 %582  ;;  %vm3067_vm5 = vmmov %vm3053_vm0 }
 0x192   :  { %v2378_v8 = vmax.f32 %v2364_v53, %v599_v63  ;;  %v2381_v17 = vmax.f32 %v2366_v54, %v583_v61  ;;  %v2403_v63 = vld [vmem:[#allocation2 + $0x58] sm:$0xff]  ;;  %v2405_v61 = vld [vmem:[#allocation2 + $0x20] sm:$0xff]  ;;  %v2461_v54 = vld [vmem:[#allocation2 + $0x68] sm:$0xff] }
 0x193   :  { %3065 = vst [vmem:[#allocation11_spill] sm:$0xff] %v2403_v63  ;;  %3066 = vst [vmem:[#allocation12_spill] sm:$0xff] %v2405_v61 }
 0x194   :  { %3059 = vst [vmem:[#allocation7_spill] sm:$0xff] %v2381_v17  ;;  %927 = vst.msk [vmem:[#allocation2 + $0x40] sm:$0xff] %vm3062_vm1, %v2378_v8  ;;  %720 = vperm.xlu0 %1578, %v2378_v8   ;;  %725 = vperm.xlu1 %1579, %v2359_v45  }
 0x195   :  { %919 = vst.msk [vmem:[#allocation2] sm:$0xff] %vm3063_vm15, %v2381_v17  ;;  %v603_v33 = vpop.xlane.xlu1 %602  ;;  %v589_v34 = vpop.xlane.xlu0 %588  ;;  %vm3071_vm1 = vmmov %vm3053_vm0 }
 0x196   :  { %v2398_v43 = vmax.f32 %v2383_v19, %v603_v33  ;;  %v2401_v44 = vmax.f32 %v2385_v23, %v589_v34  ;;  %vm3072_vm15 = vmmov %vm3053_vm0  ;;  %3079 = vst [vmem:[#allocation21_spill] sm:$0xff] %v2461_v54 }
 0x198   :  { %3064 = vst [vmem:[#allocation10_spill] sm:$0xff] %v2401_v44  ;;  %929 = vst.msk [vmem:[#allocation2 + $0x50] sm:$0xff] %vm3053_vm0, %v2398_v43  ;;  %680 = vperm.xlu1 %1579, %v2381_v17  }
 0x199   :  { %922 = vst.msk [vmem:[#allocation2 + $0x18] sm:$0xff] %vm3067_vm5, %v2401_v44  ;;  %v605_v33 = vpop.xlane.xlu0 %604  ;;  %v591_v34 = vpop.xlane.xlu1 %590  ;;  %vm3076_vm5 = vmmov %vm3053_vm0 }
 0x19a   :  { %v2417_v57 = vmax.f32 %v2403_v63, %v605_v33  ;;  %v2420_v28 = vmax.f32 %v2405_v61, %v591_v34  ;;  %v2443_v63 = vld [vmem:[#allocation2 + $0x30] sm:$0xff] }
 0x19b   :  { %3075 = vst [vmem:[#allocation18_spill] sm:$0xff] %v2443_v63 }
 0x19c   :  { %3068 = vst [vmem:[#allocation13_spill] sm:$0xff] %v2417_v57  ;;  %930 = vst.msk [vmem:[#allocation2 + $0x58] sm:$0xff] %vm3071_vm1, %v2417_v57  ;;  %695 = vperm.xlu1 %1579, %v2401_v44  }
 0x19d   :  { %923 = vst.msk [vmem:[#allocation2 + $0x20] sm:$0xff] %vm3072_vm15, %v2420_v28  ;;  %v587_v33 = vpop.xlane.xlu0 %586  ;;  %v607_v34 = vpop.xlane.xlu1 %606  ;;  %vm3081_vm1 = vmmov %vm3053_vm0 }
 0x19e   :  { %v2436_v19 = vmax.f32 %v2422_v29, %v587_v33  ;;  %v2439_v17 = vmax.f32 %v2424_v7, %v607_v34  ;;  %v2463_v29 = vld [vmem:[#allocation2 + $0x70] sm:$0xff]  ;;  %vm3082_vm15 = vmmov %vm3053_vm0 }
 0x19f   :  { %3080 = vst [vmem:[#allocation22_spill] sm:$0xff] %v2463_v29 }
 0x1a0   :  { %3073 = vst [vmem:[#allocation16_spill] sm:$0xff] %v2439_v17  ;;  %921 = vst.msk [vmem:[#allocation2 + $0x10] sm:$0xff] %vm3053_vm0, %v2436_v19  ;;  %690 = vperm.xlu0 %1578, %v2436_v19   ;;  %735 = vperm.xlu1 %1579, %v2417_v57   ;;  %v2479_v57 = vld [vmem:[#allocation2 + $0x38] sm:$0xff] }
 0x1a1   :  { %931 = vst.msk [vmem:[#allocation2 + $0x60] sm:$0xff] %vm3076_vm5, %v2439_v17  ;;  %v593_v33 = vpop.xlane.xlu0 %592  ;;  %v595_v34 = vpop.xlane.xlu1 %594  ;;  %3085 = vst [vmem:[#allocation25_spill] sm:$0xff] %v2479_v57 }
 0x1a2   :  { %v2456_v44 = vmax.f32 %v2441_v55, %v593_v33  ;;  %v2459_v23 = vmax.f32 %v2443_v63, %v595_v34  ;;  %vm3086_vm5 = vmmov %vm3053_vm0 }
 0x1a4   :  { %3077 = vst [vmem:[#allocation19_spill] sm:$0xff] %v2456_v44  ;;  %3078 = vst [vmem:[#allocation20_spill] sm:$0xff] %v2459_v23  ;;  %730 = vperm.xlu0 %1578, %v2398_v43   ;;  %705 = vperm.xlu1 %1579, %v2456_v44  }
 0x1a5   :  { %924 = vst.msk [vmem:[#allocation2 + $0x28] sm:$0xff] %vm3081_vm1, %v2456_v44  ;;  %v609_v33 = vpop.xlane.xlu0 %608  ;;  %v611_v34 = vpop.xlane.xlu1 %610  ;;  %vm3089_vm1 = vmmov %vm3053_vm0 }
 0x1a6   :  { %925 = vst.msk [vmem:[#allocation2 + $0x30] sm:$0xff] %vm3082_vm15, %v2459_v23  ;;  %v2474_v63 = vmax.f32 %v2461_v54, %v609_v33  ;;  %v2477_v7 = vmax.f32 %v2463_v29, %v611_v34  ;;  %v2492_v34 = vld [vmem:[#allocation2 + $0x78] sm:$0xff]  ;;  %vm3091_vm15 = vmmov %vm3053_vm0 }
 0x1a7   :  { %3088 = vst [vmem:[#allocation27_spill] sm:$0xff] %v2492_v34 }
 0x1a8   :  { %3083 = vst [vmem:[#allocation23_spill] sm:$0xff] %v2474_v63  ;;  %3084 = vst [vmem:[#allocation24_spill] sm:$0xff] %v2477_v7  ;;  %700 = vperm.xlu0 %1578, %v2420_v28   ;;  %745 = vperm.xlu1 %1579, %v2474_v63  }
 0x1a9   :  { %932 = vst.msk [vmem:[#allocation2 + $0x68] sm:$0xff] %vm3053_vm0, %v2474_v63  ;;  %v597_v33 = vpop.xlane.xlu0 %596  ;;  %v1035_v63 = vld [vmem:[#allocation5 + $0x20] sm:$0xff] }
 0x1aa   :  { %933 = vst.msk [vmem:[#allocation2 + $0x70] sm:$0xff] %vm3086_vm5, %v2477_v7  ;;  %v2490_v44 = vmax.f32 %v2479_v57, %v597_v33  ;;  %v3094_v33 = vmov 0.0  }
 0x1ac   :  { %3087 = vst [vmem:[#allocation26_spill] sm:$0xff] %v2490_v44  ;;  %926 = vst.msk [vmem:[#allocation2 + $0x38] sm:$0xff] %vm3089_vm1, %v2490_v44  ;;  %740 = vperm.xlu0 %1578, %v2439_v17   ;;  %715 = vperm.xlu1 %1579, %v2490_v44  }
 0x1ad   :  { %v613_v61 = vpop.xlane.xlu0 %612 }
 0x1ae   :  { %v2501_v54 = vmax.f32 %v2492_v34, %v613_v61  ;;  %v3092_v61 = vmov 0  ;;  %v513_v34 = vpop.permute.xlu1 %512 }
 0x1b0   :  { %3090 = vst [vmem:[#allocation28_spill] sm:$0xff] %v2501_v54  ;;  %934 = vst.msk [vmem:[#allocation2 + $0x78] sm:$0xff] %vm3091_vm15, %v2501_v54  ;;  %755 = vperm.xlu1 %1579, %v2501_v54  }
 0x1b1   :  { %v1088_v29 = vpop.xlane.xlu0 %1087 }
 0x1b2   :  { %v1115_v57 = vadd.f32 %v1088_v29, %v1035_v63 }
 0x1b4   :  { %1131 = vst.msk [vmem:[#allocation5 + $0x20] sm:$0xff] %vm3053_vm0, %v1115_v57 }
 0x1b9   :  { %v486_v55 = vpop.permute.xlu0 %485 }
 0x1ba   :  { %vm524_vm5 = vcmp.eq.s32.totalorder %v486_v55, %v1955_v1 }
 0x1bb   :  { %vm2512_vm1 = vmand %vm2257_vm11, %vm524_vm5  ;;  %vm523_vm5 = vcmp.eq.s32.totalorder %v2137_v21, %v1955_v1 }
 0x1bc   :  { %v3093_v61 = vsel %vm2512_vm1, 4294967295, %v3092_v61  ;;  %v1445_v54 = vsel %vm2512_vm1, 1.0, %v3094_v33  ;;  %vm525_vm1 = vcmp.eq.s32.totalorder %v2153_v27, %v1955_v1 }
 0x1bd   :  { %v492_v17 = vpop.permute.xlu0 %491 }
 0x1be   :  { %vm526_vm9 = vcmp.eq.s32.totalorder %v492_v17, %v1955_v1  ;;  %v955_v17 = vsel %vm2328_vm2, %v2216_v50, 0.0  ;;  %vm3121_vm2 = vnez %v3030_v32 }
 0x1bf   :  { %vm2522_vm15 = vmand %vm2168_vm13, %vm526_vm9  ;;  %vm530_vm9 = vcmp.eq.s32.totalorder %v2272_v11, %v1955_v1  ;;  %v3101_v11 = vmov 0 }
 0x1c0   :  { %v1447_v55 = vsel %vm2522_vm15, 1.0, %v3094_v33  ;;  %vm2542_vm13 = vmand %vm2268_vm10, %vm523_vm5 }
 0x1c1   :  { %v498_v44 = vpop.permute.xlu0 %497  ;;  %v1444_v63 = vsel %vm2542_vm13, 1.0, %v3094_v33  ;;  %vm2563_vm10 = vmand %vm2306_vm8, %vm525_vm1 }
 0x1c2   :  { %vm528_vm0 = vcmp.eq.s32.totalorder %v498_v44, %v1955_v1 }
 0x1c3   :  { %vm2534_vm11 = vmand %vm2180_vm14, %vm528_vm0 }
 0x1c4   :  { %v1449_v44 = vsel %vm2534_vm11, 1.0, %v3094_v33  ;;  %vm2556_vm0 = vmand %vm2243_vm12, %vm530_vm9  ;;  %vm3115_vm12 = vnez %v3026_v16 }
 0x1c5   :  { %v507_v29 = vpop.permute.xlu0 %506  ;;  %v3102_v11 = vsel %vm2556_vm0, 4294967295, %v3101_v11 }
 0x1c9   :  { %v510_v21 = vpop.permute.xlu0 %509 }
 0x1ca   :  { %vm532_vm5 = vcmp.eq.s32.totalorder %v510_v21, %v1955_v1  ;;  %v3105_v21 = vmov 0 }
 0x1cb   :  { %1091 = vadd.xlane.f32.xlu0 %v1445_v54  ;;  %v3097_v54 = vmov 0  ;;  %vm2577_vm9 = vmand %vm2291_vm4, %vm532_vm5  ;;  %vm3111_vm4 = vnez %v3024_v14 }
 0x1cc   :  { %v3098_v54 = vsel %vm2534_vm11, 4294967295, %v3097_v54  ;;  %vm527_vm11 = vcmp.eq.s32.totalorder %v2195_v42, %v1955_v1  ;;  %v3106_v21 = vsel %vm2577_vm9, 4294967295, %v3105_v21 }
 0x1cd   :  { %vm2583_vm1 = vmand %vm2149_vm7, %vm527_vm11  ;;  %vm531_vm11 = vcmp.eq.s32.totalorder %v507_v29, %v1955_v1  ;;  %v954_v29 = vsel %vm3115_vm12, %v2174_v35, 0.0  ;;  %vm3118_vm12 = vnez %v3016_v6  ;;  %v959_v6 = vsel %vm2522_vm15, %v2162_v30, 0.0 }
 0x1ce   :  { %v960_v27 = vsel %vm2583_vm1, %v2145_v25, 0.0  ;;  %vm3123_vm15 = vnez %v3014_v5 }
 0x1cf   :  { %1095 = vadd.xlane.f32.xlu0 %v1447_v55  ;;  %v1451_v55 = vsel %vm2556_vm0, 1.0, %v3094_v33  ;;  %vm529_vm0 = vcmp.eq.s32.totalorder %v2233_v56, %v1955_v1  ;;  %v952_v56 = vsel %vm3111_vm4, %v2143_v24, 0.0 }
 0x1d0   :  { %vm2597_vm5 = vmand %vm2220_vm3, %vm529_vm0  ;;  %vm533_vm0 = vcmp.eq.s32.totalorder %v513_v34, %v1955_v1  ;;  %v956_v1 = vsel %vm2542_vm13, %v2205_v46, 0.0  ;;  %v951_v34 = vsel %vm3118_vm12, %v2164_v31, 0.0  ;;  %vm3120_vm13 = vnez %v3093_v61 }
 0x1d1   :  { %vm2623_vm4 = vmand %vm2316_vm6, %vm533_vm0  ;;  %vm3126_vm0 = vnez %v3034_v47  ;;  %vm3128_vm12 = vnez %v3042_v10  ;;  %v962_v10 = vsel %vm2597_vm5, %v2176_v36, 0.0 }
 0x1d2   :  { %v1454_v16 = vsel %vm2623_vm4, 1.0, %v3094_v33 }
 0x1d3   :  { %1099 = vadd.xlane.f32.xlu0 %v1449_v44  ;;  %v1446_v44 = vsel %vm2563_vm10, 1.0, %v3094_v33 }
 0x1d4   :  { %1089 = vadd.xlane.f32.xlu1 %v1444_v63  ;;  %v1453_v63 = vsel %vm2577_vm9, 1.0, %v3094_v33  ;;  %vm3112_vm9 = vnez %v3044_v18 }
 0x1d5   :  { %vm2610_vm8 = vmand %vm3112_vm9, %vm531_vm11  ;;  %vm3119_vm11 = vnez %v3022_v13 }
 0x1d6   :  { %v1452_v14 = vsel %vm2610_vm8, 1.0, %v3094_v33  ;;  %v964_v18 = vsel %vm2610_vm8, %v2214_v49, 0.0 }
 0x1d7   :  { %1103 = vadd.xlane.f32.xlu0 %v1451_v55  ;;  %v1448_v55 = vsel %vm2583_vm1, 1.0, %v3094_v33  ;;  %vm3124_vm1 = vnez %v3012_v2 }
 0x1d8   :  { %1093 = vadd.xlane.f32.xlu1 %v1446_v44 }
 0x1db   :  { %1107 = vadd.xlane.f32.xlu0 %v1453_v63  ;;  %v1450_v63 = vsel %vm2597_vm5, 1.0, %v3094_v33  ;;  %v957_v33 = vsel %vm3120_vm13, %v2251_v0, 0.0 }
 0x1dc   :  { %1097 = vadd.xlane.f32.xlu1 %v1448_v55 }
 0x1df   :  { %969 = vadd.xlane.f32.xlu0 %v952_v56 }
 0x1e0   :  { %1101 = vadd.xlane.f32.xlu1 %v1450_v63  ;;  %v953_v63 = vsel %vm3119_vm11, %v2192_v41, 0.0  ;;  %vm3129_vm11 = vnez %v3048_v60  ;;  %v966_v60 = vsel %vm2623_vm4, %v2253_v3, 0.0 }
 0x1e3   :  { %973 = vadd.xlane.f32.xlu0 %v954_v29 }
 0x1e4   :  { %1105 = vadd.xlane.f32.xlu1 %v1452_v14 }
 0x1e7   :  { %977 = vadd.xlane.f32.xlu0 %v956_v1 }
 0x1e8   :  { %1109 = vadd.xlane.f32.xlu1 %v1454_v16 }
 0x1ec   :  { %967 = vadd.xlane.f32.xlu1 %v951_v34 }
 0x1f0   :  { %971 = vadd.xlane.f32.xlu1 %v953_v63 }
 0x1f4   :  { %975 = vadd.xlane.f32.xlu1 %v955_v17 }
 0x1f8   :  { %979 = vadd.xlane.f32.xlu1 %v957_v33 }
 0x1fc   :  { %983 = vadd.xlane.f32.xlu1 %v959_v6 }
 0x1fd   :  { %710 = vperm.xlu0 %1578, %v2459_v23  }
 0x201   :  { %750 = vperm.xlu0 %1578, %v2477_v7  }
 0x20b   :  { %v686_v13 = vpop.permute.xlu1 %685 }
 0x20c   :  { %v759_v29 = vsub.f32 %v2143_v24, %v686_v13 }
 0x20e   :  { %v776_v61 = vmul.f32 1.442695, %v759_v29 }
 0x20f   :  { %v721_v15 = vpop.permute.xlu0 %720  ;;  %v726_v14 = vpop.permute.xlu1 %725 }
 0x210   :  { %v766_v1 = vsub.f32 %v2162_v30, %v721_v15  ;;  %v767_v34 = vsub.f32 %v2145_v25, %v726_v14 }
 0x212   :  { %v790_v16 = vmul.f32 1.442695, %v766_v1  ;;  %v792_v57 = vmul.f32 1.442695, %v767_v34 }
 0x213   :  { %v681_v63 = vpop.permute.xlu1 %680 }
 0x214   :  { %1580 = vpow2.f32 %v790_v16  ;;  %v758_v17 = vsub.f32 %v2164_v31, %v681_v63  ;;  %v958_v31 = vsel %vm2563_vm10, %v2239_v59, 0.0  ;;  %vm3122_vm10 = vnez %v3018_v9 }
 0x215   :  { %1582 = vpow2.f32 %v776_v61 }
 0x216   :  { %1584 = vpow2.f32 %v792_v57  ;;  %v774_v6 = vmul.f32 1.442695, %v758_v17 }
 0x217   :  { %v696_v33 = vpop.permute.xlu1 %695 }
 0x218   :  { %v761_v7 = vsub.f32 %v2174_v35, %v696_v33  ;;  %1586 = vpow2.f32 %v774_v6 }
 0x21a   :  { %v780_v29 = vmul.f32 1.442695, %v761_v7 }
 0x21b   :  { %v691_v24 = vpop.permute.xlu0 %690  ;;  %v736_v13 = vpop.permute.xlu1 %735 }
 0x21c   :  { %v760_v23 = vsub.f32 %v2192_v41, %v691_v24  ;;  %v769_v15 = vsub.f32 %v2176_v36, %v736_v13  ;;  %v1041_v36 = vld [vmem:[#allocation5 + $0x50] sm:$0xff] }
 0x21e   :  { %v778_v30 = vmul.f32 1.442695, %v760_v23  ;;  %v796_v23 = vmul.f32 1.442695, %v769_v15 }
 0x21f   :  { %v731_v14 = vpop.permute.xlu0 %730  ;;  %v706_v1 = vpop.permute.xlu1 %705 }
 0x220   :  { %1588 = vpow2.f32 %v778_v30  ;;  %v768_v16 = vsub.f32 %v2190_v40, %v731_v14  ;;  %981 = vadd.xlane.f32.xlu0 %v958_v31  ;;  %v763_v7 = vsub.f32 %v2205_v46, %v706_v1 }
 0x221   :  { %v1581_v35 = vpop.eup %1580  ;;  %1590 = vpow2.f32 %v780_v29 }
 0x222   :  { %v794_v61 = vmul.f32 1.442695, %v768_v16  ;;  %v814_v41 = vsel %vm3121_vm2, %v1581_v35, 0.0  ;;  %v1583_v57 = vpop.eup %1582  ;;  %v784_v32 = vmul.f32 1.442695, %v763_v7 }
 0x223   :  { %v701_v34 = vpop.permute.xlu0 %700  ;;  %870 = vadd.xlane.f32.xlu1 %v814_v41  ;;  %v746_v63 = vpop.permute.xlu1 %745  ;;  %v807_v46 = vsel %vm3122_vm10, %v1583_v57, 0.0 }
 0x224   :  { %1592 = vpow2.f32 %v794_v61  ;;  %v762_v17 = vsub.f32 %v2216_v50, %v701_v34  ;;  %985 = vadd.xlane.f32.xlu0 %v960_v27  ;;  %v771_v6 = vsub.f32 %v2214_v49, %v746_v63  ;;  %v1585_v30 = vpop.eup %1584 }
 0x225   :  { %1594 = vpow2.f32 %v796_v23  ;;  %v815_v15 = vsel %vm2149_vm7, %v1585_v30, 0.0  ;;  %v1587_v14 = vpop.eup %1586  ;;  %vm3125_vm7 = vnez %v3020_v12  ;;  %v1036_v30 = vld [vmem:[#allocation5 + $0x28] sm:$0xff] }
 0x226   :  { %v782_v33 = vmul.f32 1.442695, %v762_v17  ;;  %v800_v29 = vmul.f32 1.442695, %v771_v6  ;;  %v806_v61 = vsel %vm3124_vm1, %v1587_v14, 0.0  ;;  %v1037_v6 = vld [vmem:[#allocation5 + $0x30] sm:$0xff] }
 0x227   :  { %v741_v24 = vpop.permute.xlu0 %740  ;;  %v716_v13 = vpop.permute.xlu1 %715 }
 0x228   :  { %1596 = vpow2.f32 %v782_v33  ;;  %v770_v42 = vsub.f32 %v2237_v58, %v741_v24  ;;  %856 = vadd.xlane.f32.xlu0 %v807_v46  ;;  %v765_v50 = vsub.f32 %v2239_v59, %v716_v13  ;;  %v1039_v13 = vld [vmem:[#allocation5 + $0x40] sm:$0xff] }
 0x229   :  { %1598 = vpow2.f32 %v784_v32 }
 0x22a   :  { %v798_v25 = vmul.f32 1.442695, %v770_v42  ;;  %v788_v16 = vmul.f32 1.442695, %v765_v50 }
 0x22b   :  { %v756_v1 = vpop.permute.xlu1 %755 }
 0x22c   :  { %1600 = vpow2.f32 %v798_v25  ;;  %872 = vadd.xlane.f32.xlu0 %v815_v15  ;;  %v773_v35 = vsub.f32 %v2253_v3, %v756_v1  ;;  %v1038_v3 = vld [vmem:[#allocation5 + $0x38] sm:$0xff]  ;;  %v1045_v1 = vld [vmem:[#allocation5 + $0x70] sm:$0xff] }
 0x22d   :  { %v1589_v31 = vpop.eup %1588  ;;  %1602 = vpow2.f32 %v800_v29  ;;  %v1043_v29 = vld [vmem:[#allocation5 + $0x60] sm:$0xff] }
 0x22e   :  { %v808_v9 = vsel %vm3123_vm15, %v1589_v31, 0.0  ;;  %v1591_v59 = vpop.eup %1590  ;;  %1604 = vpow2.f32 %v788_v16  ;;  %v804_v23 = vmul.f32 1.442695, %v773_v35  ;;  %v1040_v31 = vld [vmem:[#allocation5 + $0x48] sm:$0xff] }
 0x22f   :  { %858 = vadd.xlane.f32.xlu1 %v808_v9  ;;  %v809_v5 = vsel %vm3125_vm7, %v1591_v59, 0.0  ;;  %v936_v59 = vld [vmem:[#allocation4 + $0x8] sm:$0xff] }
 0x230   :  { %854 = vadd.xlane.f32.xlu0 %v806_v61  ;;  %1606 = vpow2.f32 %v804_v23 }
 0x231   :  { %v1593_v26 = vpop.eup %1592 }
 0x232   :  { %v816_v41 = vsel %vm2180_vm14, %v1593_v26, 0.0  ;;  %v1595_v7 = vpop.eup %1594  ;;  %vm3127_vm14 = vnez %v3038_v62  ;;  %v1042_v26 = vld [vmem:[#allocation5 + $0x58] sm:$0xff] }
 0x233   :  { %874 = vadd.xlane.f32.xlu1 %v816_v41  ;;  %v817_v2 = vsel %vm2220_vm3, %v1595_v7, 0.0  ;;  %vm3130_vm3 = vcmask 7168  }
 0x234   :  { %860 = vadd.xlane.f32.xlu0 %v809_v5  ;;  %vm3132_vm8 = vmmov %vm3130_vm3 }
 0x235   :  { %v1597_v34 = vpop.eup %1596  ;;  %vm3134_vm5 = vmmov %vm3130_vm3 }
 0x236   :  { %v810_v63 = vsel %vm3126_vm0, %v1597_v34, 0.0  ;;  %v1599_v27 = vpop.eup %1598  ;;  %vm3135_vm4 = vmmov %vm3130_vm3  ;;  %v938_v34 = vld [vmem:[#allocation4 + $0x18] sm:$0xff] }
 0x237   :  { %862 = vadd.xlane.f32.xlu1 %v810_v63  ;;  %v811_v12 = vsel %vm3128_vm12, %v1599_v27, 0.0  ;;  %vm3136_vm13 = vmmov %vm3130_vm3  ;;  %v1044_v63 = vld [vmem:[#allocation5 + $0x68] sm:$0xff] }
 0x238   :  { %876 = vadd.xlane.f32.xlu0 %v817_v2  ;;  %vm3137_vm2 = vmmov %vm3130_vm3 }
 0x239   :  { %v1601_v37 = vpop.eup %1600  ;;  %vm3138_vm10 = vmmov %vm3137_vm2 }
 0x23a   :  { %v818_v57 = vsel %vm3127_vm14, %v1601_v37, 0.0  ;;  %v1603_v17 = vpop.eup %1602  ;;  %vm3139_vm15 = vmmov %vm3137_vm2 }
 0x23b   :  { %878 = vadd.xlane.f32.xlu1 %v818_v57  ;;  %v819_v47 = vsel %vm3112_vm9, %v1603_v17, 0.0  ;;  %v1605_v33 = vpop.eup %1604  ;;  %vm3133_vm9 = vmmov %vm3130_vm3  ;;  %v1046_v17 = vld [vmem:[#allocation5 + $0x78] sm:$0xff] }
 0x23c   :  { %864 = vadd.xlane.f32.xlu0 %v811_v12  ;;  %v813_v51 = vsel %vm3129_vm11, %v1605_v33, 0.0  ;;  %v940_v12 = vld [vmem:[#allocation4 + $0x28] sm:$0xff]  ;;  %vm3140_vm1 = vmmov %vm3137_vm2 }
 0x23d   :  { %v1607_v32 = vpop.eup %1606  ;;  %vm3141_vm7 = vmmov %vm3140_vm1 }
 0x23e   :  { %v821_v62 = vsel %vm2316_vm6, %v1607_v32, 0.0  ;;  %vm3131_vm6 = vmmov %vm3130_vm3 }
 0x23f   :  { %vm3142_vm0 = vmmov %vm3140_vm1 }
 0x240   :  { %880 = vadd.xlane.f32.xlu0 %v819_v47  ;;  %vm3143_vm14 = vmmov %vm3142_vm0 }
 0x241   :  { %vm3144_vm12 = vmmov %vm3142_vm0 }
 0x242   :  { %vm3145_vm11 = vmmov %vm3142_vm0 }
 0x244   :  { %868 = vadd.xlane.f32.xlu0 %v813_v51 }
 0x248   :  { %884 = vadd.xlane.f32.xlu0 %v821_v62  ;;  %v935_v62 = vld [vmem:[#allocation4] sm:$0xff] }
 0x24c   :  { %989 = vadd.xlane.f32.xlu0 %v962_v10 }
 0x250   :  { %993 = vadd.xlane.f32.xlu0 %v964_v18 }
 0x254   :  { %v1092_v24 = vpop.xlane.xlu0 %1091  ;;  %997 = vadd.xlane.f32.xlu0 %v966_v60 }
 0x255   :  { %v1117_v52 = vadd.f32 %v1092_v24, %v1037_v6  ;;  %v937_v6 = vld [vmem:[#allocation4 + $0x10] sm:$0xff] }
 0x257   :  { %1133 = vst.msk [vmem:[#allocation5 + $0x30] sm:$0xff] %vm3130_vm3, %v1117_v52  ;;  %vm3146_vm3 = vmmov %vm3142_vm0 }
 0x258   :  { %v1096_v46 = vpop.xlane.xlu0 %1095 }
 0x259   :  { %v1119_v44 = vadd.f32 %v1096_v46, %v1039_v13 }
 0x25b   :  { %1135 = vst.msk [vmem:[#allocation5 + $0x40] sm:$0xff] %vm3131_vm6, %v1119_v44  ;;  %v939_v44 = vld [vmem:[#allocation4 + $0x20] sm:$0xff]  ;;  %vm3147_vm6 = vmmov %vm3142_vm0 }
 0x25c   :  { %v1100_v55 = vpop.xlane.xlu0 %1099 }
 0x25d   :  { %v1121_v49 = vadd.f32 %v1100_v55, %v1041_v36  ;;  %v1090_v42 = vpop.xlane.xlu1 %1089 }
 0x25e   :  { %v1116_v25 = vadd.f32 %v1090_v42, %v1036_v30 }
 0x25f   :  { %1137 = vst.msk [vmem:[#allocation5 + $0x50] sm:$0xff] %vm3132_vm8, %v1121_v49  ;;  %vm3148_vm8 = vmmov %vm3142_vm0 }
 0x260   :  { %1132 = vst.msk [vmem:[#allocation5 + $0x28] sm:$0xff] %vm3133_vm9, %v1116_v25  ;;  %v1104_v56 = vpop.xlane.xlu0 %1103  ;;  %v941_v25 = vld [vmem:[#allocation4 + $0x30] sm:$0xff]  ;;  %vm3149_vm9 = vnez %v3040_v4 }
 0x261   :  { %v1123_v50 = vadd.f32 %v1104_v56, %v1043_v29  ;;  %v1094_v15 = vpop.xlane.xlu1 %1093 }
 0x262   :  { %v1118_v14 = vadd.f32 %v1094_v15, %v1038_v3 }
 0x263   :  { %1139 = vst.msk [vmem:[#allocation5 + $0x60] sm:$0xff] %vm3134_vm5, %v1123_v50  ;;  %vm3150_vm5 = vnez %v3046_v22 }
 0x264   :  { %1134 = vst.msk [vmem:[#allocation5 + $0x38] sm:$0xff] %vm3135_vm4, %v1118_v14  ;;  %v1108_v9 = vpop.xlane.xlu0 %1107  ;;  %vm3151_vm4 = vnez %v3098_v54 }
 0x265   :  { %v1125_v16 = vadd.f32 %v1108_v9, %v1045_v1  ;;  %v1098_v35 = vpop.xlane.xlu1 %1097  ;;  %v961_v9 = vsel %vm3151_vm4, %v2190_v40, 0.0  ;;  %v3156_v40 = vsub.f32 %v2354_v38, %v2359_v45  ;;  %v3164_v38 = vld [vmem:[#allocation9_spill] sm:$0xff]  ;;  %v3165_v45 = vld [vmem:[#allocation10_spill] sm:$0xff] }
 0x266   :  { %v1120_v61 = vadd.f32 %v1098_v35, %v1040_v31 }
 0x267   :  { %1141 = vst.msk [vmem:[#allocation5 + $0x70] sm:$0xff] %vm3136_vm13, %v1125_v16  ;;  %v3152_v16 = vsub.f32 %v2364_v53, %v2378_v8  ;;  %vm3153_vm13 = vnez %v3102_v11  ;;  %v664_v53 = vmul.f32 1.442695, %v3156_v40  ;;  %v3157_v8 = vld [vmem:[#allocation14_spill] sm:$0xff] }
 0x268   :  { %1136 = vst.msk [vmem:[#allocation5 + $0x48] sm:$0xff] %vm3137_vm2, %v1120_v61  ;;  %v970_v41 = vpop.xlane.xlu0 %969  ;;  %v963_v4 = vsel %vm3153_vm13, %v2237_v58, 0.0  ;;  %vm3154_vm2 = vnez %v3106_v21  ;;  %v3155_v61 = vsub.f32 %v2356_v39, %v2362_v48  ;;  %v3158_v11 = vsub.f32 %v3157_v8, %v2436_v19  ;;  %v942_v48 = vld [vmem:[#allocation4 + $0x38] sm:$0xff]  ;;  %v3186_v8 = vld [vmem:[#allocation26_spill] sm:$0xff]  ;;  %vm3199_vm13 = vmmov %vm3142_vm0 }
 0x269   :  { %v1000_v23 = vadd.f32 %v970_v41, %v936_v59  ;;  %v1102_v5 = vpop.xlane.xlu1 %1101  ;;  %v662_v35 = vmul.f32 1.442695, %v3152_v16  ;;  %v965_v22 = vsel %vm3154_vm2, %v2287_v20, 0.0  ;;  %v3159_v59 = vld [vmem:[#allocation6_spill] sm:$0xff]  ;;  %v824_v16 = vld [vmem:[#allocation3 + $0x10] sm:$0xff]  ;;  %vm3200_vm2 = vmmov %vm3142_vm0 }
 0x26a   :  { %v1122_v7 = vadd.f32 %v1102_v5, %v1042_v26  ;;  %v648_v54 = vmul.f32 1.442695, %v3155_v61  ;;  %v650_v58 = vmul.f32 1.442695, %v3158_v11  ;;  %v3160_v26 = vld [vmem:[#allocation7_spill] sm:$0xff] }
 0x26b   :  { %1016 = vst.msk [vmem:[#allocation4 + $0x8] sm:$0xff] %vm3138_vm10, %v1000_v23  ;;  %v3161_v41 = vsub.f32 %v3159_v59, %v3160_v26  ;;  %vm3172_vm10 = vmmov %vm3142_vm0 }
 0x26c   :  { %1138 = vst.msk [vmem:[#allocation5 + $0x58] sm:$0xff] %vm3139_vm15, %v1122_v7  ;;  %v974_v2 = vpop.xlane.xlu0 %973  ;;  %v3166_v7 = vsub.f32 %v3164_v38, %v3165_v45  ;;  %vm3176_vm15 = vmmov %vm3142_vm0  ;;  %v825_v38 = vld [vmem:[#allocation3 + $0x18] sm:$0xff]  ;;  %v2793_v45 = vld [vmem:[#allocation5] sm:$0xff] }
 0x26d   :  { %v1002_v27 = vadd.f32 %v974_v2, %v938_v34  ;;  %v1106_v37 = vpop.xlane.xlu1 %1105  ;;  %v646_v21 = vmul.f32 1.442695, %v3161_v41 }
 0x26e   :  { %v1124_v57 = vadd.f32 %v1106_v37, %v1044_v63  ;;  %v652_v34 = vmul.f32 1.442695, %v3166_v7  ;;  %v830_v63 = vld [vmem:[#allocation3 + $0x40] sm:$0xff]  ;;  %v3188_v7 = vld [vmem:[#allocation27_spill] sm:$0xff] }
 0x26f   :  { %1018 = vst.msk [vmem:[#allocation4 + $0x18] sm:$0xff] %vm3140_vm1, %v1002_v27  ;;  %v3167_v27 = vld [vmem:[#allocation12_spill] sm:$0xff]  ;;  %vm3180_vm1 = vmmov %vm3142_vm0  ;;  %v2790_v41 = vld [vmem:[#allocation5 + $0x48] sm:$0xff] }
 0x270   :  { %1140 = vst.msk [vmem:[#allocation5 + $0x68] sm:$0xff] %vm3141_vm7, %v1124_v57  ;;  %v978_v47 = vpop.xlane.xlu0 %977  ;;  %v3168_v37 = vsub.f32 %v3167_v27, %v2420_v28  ;;  %vm3184_vm7 = vmmov %vm3142_vm0  ;;  %v2798_v27 = vld [vmem:[#allocation5 + $0x10] sm:$0xff] }
 0x271   :  { %v1004_v33 = vadd.f32 %v978_v47, %v940_v12  ;;  %v1110_v51 = vpop.xlane.xlu1 %1109  ;;  %v3170_v47 = vld [vmem:[#allocation13_spill] sm:$0xff] }
 0x272   :  { %v1126_v32 = vadd.f32 %v1110_v51, %v1046_v17  ;;  %v654_v57 = vmul.f32 1.442695, %v3168_v37  ;;  %v944_v17 = vld [vmem:[#allocation4 + $0x48] sm:$0xff]  ;;  %v1171_v37 = vmax.f32 %v2790_v41, 1.0 }
 0x273   :  { %1020 = vst.msk [vmem:[#allocation4 + $0x28] sm:$0xff] %vm3142_vm0, %v1004_v33 }
 0x274   :  { %1142 = vst.msk [vmem:[#allocation5 + $0x78] sm:$0xff] %vm3143_vm14, %v1126_v32  ;;  %vm3191_vm14 = vmmov %vm3142_vm0 }
 0x275   :  { %v968_v10 = vpop.xlane.xlu1 %967 }
 0x276   :  { %v999_v18 = vadd.f32 %v968_v10, %v935_v62 }
 0x278   :  { %1015 = vst.msk [vmem:[#allocation4] sm:$0xff] %vm3144_vm12, %v999_v18  ;;  %v711_v60 = vpop.permute.xlu0 %710  ;;  %vm3192_vm12 = vmmov %vm3142_vm0 }
 0x279   :  { %v764_v24 = vsub.f32 %v2251_v0, %v711_v60  ;;  %v972_v52 = vpop.xlane.xlu1 %971  ;;  %v943_v0 = vld [vmem:[#allocation4 + $0x40] sm:$0xff] }
 0x27a   :  { %v1001_v13 = vadd.f32 %v972_v52, %v937_v6  ;;  %v823_v6 = vld [vmem:[#allocation3 + $0x8] sm:$0xff]  ;;  %v3174_v52 = vld [vmem:[#allocation16_spill] sm:$0xff] }
 0x27b   :  { %v786_v46 = vmul.f32 1.442695, %v764_v24  ;;  %v3173_v24 = vld [vmem:[#allocation15_spill] sm:$0xff] }
 0x27c   :  { %1017 = vst.msk [vmem:[#allocation4 + $0x10] sm:$0xff] %vm3145_vm11, %v1001_v13  ;;  %v751_v36 = vpop.permute.xlu0 %750  ;;  %v3175_v28 = vsub.f32 %v3173_v24, %v3174_v52  ;;  %vm3193_vm11 = vmmov %vm3142_vm0 }
 0x27d   :  { %1608 = vpow2.f32 %v786_v46  ;;  %v772_v30 = vsub.f32 %v2287_v20, %v751_v36  ;;  %v976_v55 = vpop.xlane.xlu1 %975  ;;  %v3162_v20 = vld [vmem:[#allocation8_spill] sm:$0xff]  ;;  %v2772_v46 = vld [vmem:[#allocation5 + $0x40] sm:$0xff]  ;;  %v3178_v36 = vld [vmem:[#allocation19_spill] sm:$0xff] }
 0x27e   :  { %v1003_v49 = vadd.f32 %v976_v55, %v939_v44  ;;  %v3163_v23 = vsub.f32 %v3162_v20, %v2398_v43  ;;  %v3169_v43 = vld [vmem:[#allocation11_spill] sm:$0xff]  ;;  %v670_v13 = vmul.f32 1.442695, %v3175_v28  ;;  %v3177_v44 = vld [vmem:[#allocation17_spill] sm:$0xff]  ;;  %vm1346_vm4 = vcmp.gt.f32.partialorder %v2772_v46, 0.0 }
 0x27f   :  { %v802_v42 = vmul.f32 1.442695, %v772_v30  ;;  %v3171_v33 = vsub.f32 %v3169_v43, %v3170_v47  ;;  %v3179_v30 = vsub.f32 %v3177_v44, %v3178_v36 }
 0x280   :  { %1019 = vst.msk [vmem:[#allocation4 + $0x20] sm:$0xff] %vm3146_vm3, %v1003_v49  ;;  %v666_v39 = vmul.f32 1.442695, %v3163_v23  ;;  %v832_v23 = vld [vmem:[#allocation3 + $0x50] sm:$0xff]  ;;  %vm3194_vm3 = vmmov %vm3142_vm0 }
 0x281   :  { %1610 = vpow2.f32 %v802_v42  ;;  %v980_v29 = vpop.xlane.xlu1 %979  ;;  %v668_v51 = vmul.f32 1.442695, %v3171_v33  ;;  %v656_v55 = vmul.f32 1.442695, %v3179_v30  ;;  %v826_v33 = vld [vmem:[#allocation3 + $0x20] sm:$0xff]  ;;  %v2807_v30 = vld [vmem:[#allocation5 + $0x18] sm:$0xff] }
 0x282   :  { %v1005_v3 = vadd.f32 %v980_v29, %v941_v25  ;;  %1612 = vpow2.f32 %v662_v35  ;;  %v831_v29 = vld [vmem:[#allocation3 + $0x48] sm:$0xff] }
 0x283   :  { %1614 = vpow2.f32 %v648_v54 }
 0x284   :  { %1021 = vst.msk [vmem:[#allocation4 + $0x30] sm:$0xff] %vm3147_vm6, %v1005_v3  ;;  %1616 = vpow2.f32 %v664_v53  ;;  %v1170_v3 = vmax.f32 %v2772_v46, 1.0  ;;  %v3185_v53 = vld [vmem:[#allocation25_spill] sm:$0xff]  ;;  %vm3195_vm6 = vmmov %vm3142_vm0 }
 0x285   :  { %v984_v56 = vpop.xlane.xlu1 %983  ;;  %1618 = vpow2.f32 %v650_v58  ;;  %v3187_v11 = vsub.f32 %v3185_v53, %v3186_v8 }
 0x286   :  { %v1007_v50 = vadd.f32 %v984_v56, %v943_v0  ;;  %1620 = vpow2.f32 %v646_v21  ;;  %v2780_v56 = vld [vmem:[#allocation5 + $0x8] sm:$0xff] }
 0x287   :  { %1622 = vpow2.f32 %v666_v39  ;;  %v1163_v61 = vmax.f32 %v2780_v56, 1.0  ;;  %v660_v58 = vmul.f32 1.442695, %v3187_v11 }
 0x288   :  { %1023 = vst.msk [vmem:[#allocation4 + $0x40] sm:$0xff] %vm3148_vm8, %v1007_v50  ;;  %1624 = vpow2.f32 %v652_v34  ;;  %v3189_v34 = vld [vmem:[#allocation28_spill] sm:$0xff]  ;;  %vm3196_vm8 = vmmov %vm3142_vm0 }
 0x289   :  { %1626 = vpow2.f32 %v654_v57 }
 0x28a   :  { %v1609_v15 = vpop.eup %1608  ;;  %1628 = vpow2.f32 %v668_v51 }
 0x28b   :  { %v812_v14 = vsel %vm3149_vm9, %v1609_v15, 0.0  ;;  %1630 = vpow2.f32 %v670_v13  ;;  %v3181_v15 = vld [vmem:[#allocation21_spill] sm:$0xff]  ;;  %vm3197_vm9 = vmmov %vm3142_vm0 }
 0x28c   :  { %866 = vadd.xlane.f32.xlu1 %v812_v14  ;;  %1632 = vpow2.f32 %v656_v55  ;;  %v3182_v14 = vld [vmem:[#allocation23_spill] sm:$0xff] }
 0x28d   :  { %1634 = vrcp.f32 %v1170_v3 }
 0x28e   :  { %v1611_v1 = vpop.eup %1610 }
 0x28f   :  { %v820_v31 = vsel %vm3150_vm5, %v1611_v1, 0.0  ;;  %v1613_v5 = vpop.eup %1612  ;;  %v3183_v1 = vsub.f32 %v3181_v15, %v3182_v14  ;;  %v1186_v24 = vld [vmem:[#allocation4 + $0x40] sm:$0xff]  ;;  %v827_v15 = vld [vmem:[#allocation3 + $0x28] sm:$0xff]  ;;  %vm3198_vm5 = vmmov %vm3142_vm0 }
 0x290   :  { %882 = vadd.xlane.f32.xlu1 %v820_v31  ;;  %v846_v12 = vmul.f32 %v1613_v5, %v830_v63  ;;  %v1615_v62 = vpop.eup %1614  ;;  %v3190_v63 = vsub.f32 %v3188_v7, %v3189_v34  ;;  %v2810_v14 = vld [vmem:[#allocation5 + $0x20] sm:$0xff] }
 0x291   :  { %v839_v49 = vmul.f32 %v1615_v62, %v823_v6  ;;  %v1617_v42 = vpop.eup %1616  ;;  %v672_v31 = vmul.f32 1.442695, %v3183_v1  ;;  %v1164_v6 = vmax.f32 %v2798_v27, 1.0  ;;  %v1166_v11 = vmax.f32 %v2810_v14, 1.0 }
 0x292   :  { %v1619_v50 = vpop.eup %1618 }
 0x293   :  { %v1621_v35 = vpop.eup %1620  ;;  %v840_v59 = vmul.f32 %v1619_v50, %v824_v16  ;;  %v1165_v16 = vmax.f32 %v2807_v30, 1.0 }
 0x294   :  { %987 = vadd.xlane.f32.xlu1 %v961_v9  ;;  %v847_v9 = vmul.f32 %v1617_v42, %v831_v29  ;;  %v1623_v26 = vpop.eup %1622  ;;  %v834_v42 = vld [vmem:[#allocation3 + $0x60] sm:$0xff]  ;;  %v1195_v29 = vld [vmem:[#allocation2 + $0x8] sm:$0xff] }
 0x295   :  { %v1625_v39 = vpop.eup %1624 }
 0x296   :  { %v841_v47 = vmul.f32 %v1625_v39, %v825_v38  ;;  %v1203_v38 = vld [vmem:[#allocation2 + $0x48] sm:$0xff] }
 0x298   :  { %991 = vadd.xlane.f32.xlu1 %v963_v4 }
 0x29c   :  { %995 = vadd.xlane.f32.xlu1 %v965_v22  ;;  %v822_v22 = vld [vmem:[#allocation3] sm:$0xff] }
 0x29d   :  { %v838_v20 = vmul.f32 %v1621_v35, %v822_v22  ;;  %v1179_v35 = vld [vmem:[#allocation4 + $0x8] sm:$0xff] }
 0x2a9   :  { %v982_v19 = vpop.xlane.xlu0 %981 }
 0x2aa   :  { %v1006_v2 = vadd.f32 %v982_v19, %v942_v48  ;;  %v676_v19 = vmul.f32 1.442695, %v3190_v63 }
 0x2ac   :  { %1022 = vst.msk [vmem:[#allocation4 + $0x38] sm:$0xff] %vm3172_vm10, %v1006_v2  ;;  %v871_v32 = vpop.xlane.xlu1 %870  ;;  %vm1339_vm10 = vcmp.gt.f32.partialorder %v2780_v56, 0.0 }
 0x2ad   :  { %v894_v10 = vadd.f32 %v871_v32, %v846_v12  ;;  %v986_v18 = vpop.xlane.xlu0 %985  ;;  %v848_v12 = vmul.f32 %v1623_v26, %v832_v23  ;;  %v1162_v32 = vmax.f32 %v2793_v45, 1.0  ;;  %v1194_v23 = vld [vmem:[#allocation2] sm:$0xff] }
 0x2ae   :  { %v1008_v60 = vadd.f32 %v986_v18, %v944_v17  ;;  %v1627_v17 = vpop.eup %1626  ;;  %v833_v18 = vld [vmem:[#allocation3 + $0x58] sm:$0xff] }
 0x2af   :  { %911 = vst.msk [vmem:[#allocation3 + $0x40] sm:$0xff] %vm3176_vm15, %v894_v10  ;;  %v1629_v51 = vpop.eup %1628  ;;  %v842_v44 = vmul.f32 %v1627_v17, %v826_v33  ;;  %vm3201_vm15 = vmmov %vm3142_vm0 }
 0x2b0   :  { %1024 = vst.msk [vmem:[#allocation4 + $0x48] sm:$0xff] %vm3180_vm1, %v1008_v60  ;;  %v1202_v60 = vld [vmem:[#allocation2 + $0x40] sm:$0xff]  ;;  %v1631_v36 = vpop.eup %1630  ;;  %vm3202_vm1 = vmmov %vm3142_vm0 }
 0x2b1   :  { %v857_v25 = vpop.xlane.xlu0 %856  ;;  %v1218_v28 = vmul.f32 %v1202_v60, %v2772_v46  ;;  %v850_v22 = vmul.f32 %v1631_v36, %v834_v42  ;;  %v2826_v46 = vld [vmem:[#allocation5 + $0x38] sm:$0xff] }
 0x2b2   :  { %v887_v0 = vadd.f32 %v857_v25, %v839_v49  ;;  %v849_v49 = vmul.f32 %v1629_v51, %v833_v18  ;;  %v1633_v25 = vpop.eup %1632  ;;  %v829_v51 = vld [vmem:[#allocation3 + $0x38] sm:$0xff] }
 0x2b3   :  { %v1234_v3 = vsub.f32 %v1186_v24, %v1218_v28  ;;  %v843_v53 = vmul.f32 %v1633_v25, %v827_v15  ;;  %v837_v25 = vld [vmem:[#allocation3 + $0x78] sm:$0xff] }
 0x2b4   :  { %904 = vst.msk [vmem:[#allocation3 + $0x8] sm:$0xff] %vm3184_vm7, %v887_v0  ;;  %vm1347_vm7 = vcmp.gt.f32.partialorder %v2790_v41, 0.0 }
 0x2b5   :  { %v873_v4 = vpop.xlane.xlu0 %872 }
 0x2b6   :  { %v1282_v54 = vld [vmem:[#allocation3 + $0x40] sm:$0xff]  ;;  %v895_v40 = vadd.f32 %v873_v4, %v847_v9  ;;  %v1635_v9 = vpop.eup %1634 }
 0x2b7   :  { %1636 = vlog2.f32 %v1282_v54  ;;  %v1211_v54 = vmul.f32 %v1195_v29, %v2780_v56  ;;  %v1187_v34 = vld [vmem:[#allocation4 + $0x48] sm:$0xff] }
 0x2b8   :  { %1638 = vpow2.f32 %v672_v31  ;;  %912 = vst.msk [vmem:[#allocation3 + $0x48] sm:$0xff] %vm3142_vm0, %v895_v40  ;;  %v859_v21 = vpop.xlane.xlu1 %858  ;;  %vm1340_vm0 = vcmp.gt.f32.partialorder %v2798_v27, 0.0 }
 0x2b9   :  { %v888_v48 = vadd.f32 %v859_v21, %v840_v59  ;;  %v855_v5 = vpop.xlane.xlu0 %854  ;;  %1640 = vrcp.f32 %v1163_v61  ;;  %v1227_v39 = vsub.f32 %v1179_v35, %v1211_v54  ;;  %v1169_v54 = vmax.f32 %v2826_v46, 1.0 }
 0x2ba   :  { %v886_v2 = vadd.f32 %v855_v5, %v838_v20  ;;  %1642 = vpow2.f32 %v660_v58  ;;  %v1259_v58 = vmul.f32 %v1635_v9, %v1234_v3  ;;  %v835_v20 = vld [vmem:[#allocation3 + $0x68] sm:$0xff]  ;;  %v2834_v3 = vld [vmem:[#allocation5 + $0x58] sm:$0xff] }
 0x2bb   :  { %v1275_v57 = vld [vmem:[#allocation3 + $0x8] sm:$0xff]  ;;  %905 = vst.msk [vmem:[#allocation3 + $0x10] sm:$0xff] %vm3191_vm14, %v888_v48  ;;  %vm3203_vm14 = vmmov %vm3202_vm1 }
 0x2bc   :  { %1644 = vlog2.f32 %v1275_v57  ;;  %903 = vst.msk [vmem:[#allocation3] sm:$0xff] %vm3192_vm12, %v886_v2  ;;  %v875_v43 = vpop.xlane.xlu1 %874  ;;  %v1196_v2 = vld [vmem:[#allocation2 + $0x10] sm:$0xff]  ;;  %v1219_v57 = vmul.f32 %v1203_v38, %v2790_v41  ;;  %vm3204_vm12 = vmmov %vm3202_vm1 }
 0x2bd   :  { %v896_v62 = vadd.f32 %v875_v43, %v848_v12  ;;  %v861_v10 = vpop.xlane.xlu0 %860  ;;  %1646 = vpow2.f32 %v676_v19  ;;  %v1210_v43 = vmul.f32 %v1194_v23, %v2793_v45  ;;  %v1212_v28 = vmul.f32 %v1196_v2, %v2798_v27 }
 0x2be   :  { %v889_v52 = vadd.f32 %v861_v10, %v841_v47  ;;  %1648 = vrcp.f32 %v1171_v37  ;;  %v2818_v37 = vld [vmem:[#allocation5 + $0x28] sm:$0xff]  ;;  %v1180_v10 = vld [vmem:[#allocation4 + $0x10] sm:$0xff]  ;;  %v1235_v18 = vsub.f32 %v1187_v34, %v1219_v57  ;;  %v1182_v34 = vld [vmem:[#allocation4 + $0x20] sm:$0xff] }
 0x2bf   :  { %v1283_v13 = vld [vmem:[#allocation3 + $0x48] sm:$0xff]  ;;  %913 = vst.msk [vmem:[#allocation3 + $0x50] sm:$0xff] %vm3193_vm11, %v896_v62  ;;  %v1178_v62 = vld [vmem:[#allocation4] sm:$0xff]  ;;  %vm1338_vm11 = vcmp.gt.f32.partialorder %v2793_v45, 0.0 }
 0x2c0   :  { %1650 = vlog2.f32 %v1283_v13  ;;  %906 = vst.msk [vmem:[#allocation3 + $0x18] sm:$0xff] %vm3194_vm3, %v889_v52  ;;  %v863_v55 = vpop.xlane.xlu1 %862  ;;  %v1167_v13 = vmax.f32 %v2818_v37, 1.0  ;;  %vm3205_vm3 = vmmov %vm3202_vm1 }
 0x2c1   :  { %1652 = vrcp.f32 %v1162_v32  ;;  %v890_v0 = vadd.f32 %v863_v55, %v842_v44  ;;  %v877_v50 = vpop.xlane.xlu0 %876  ;;  %v1197_v55 = vld [vmem:[#allocation2 + $0x18] sm:$0xff] }
 0x2c2   :  { %1654 = vrcp.f32 %v1164_v6  ;;  %v1276_v1 = vld [vmem:[#allocation3 + $0x10] sm:$0xff]  ;;  %v897_v31 = vadd.f32 %v877_v50, %v849_v49  ;;  %v1228_v50 = vsub.f32 %v1180_v10, %v1212_v28 }
 0x2c3   :  { %1656 = vlog2.f32 %v1276_v1  ;;  %v1274_v4 = vld [vmem:[#allocation3] sm:$0xff]  ;;  %907 = vst.msk [vmem:[#allocation3 + $0x20] sm:$0xff] %vm3195_vm6, %v890_v0  ;;  %v1226_v0 = vsub.f32 %v1178_v62, %v1210_v43  ;;  %v946_v43 = vld [vmem:[#allocation4 + $0x58] sm:$0xff]  ;;  %vm3206_vm6 = vmmov %vm3202_vm1 }
 0x2c4   :  { %v1637_v61 = vpop.eup %1636  ;;  %1658 = vlog2.f32 %v1274_v4  ;;  %914 = vst.msk [vmem:[#allocation3 + $0x58] sm:$0xff] %vm3196_vm8, %v897_v31  ;;  %v879_v40 = vpop.xlane.xlu1 %878  ;;  %v1181_v31 = vld [vmem:[#allocation4 + $0x18] sm:$0xff]  ;;  %vm3207_vm8 = vmmov %vm3202_vm1 }
 0x2c5   :  { %v1639_v8 = vpop.eup %1638  ;;  %v1307_v59 = vmul.f32 0.6931472, %v1637_v61  ;;  %v898_v26 = vadd.f32 %v879_v40, %v850_v22  ;;  %v865_v21 = vpop.xlane.xlu0 %864  ;;  %1660 = vrcp.f32 %v1165_v16  ;;  %v1213_v61 = vmul.f32 %v1197_v55, %v2807_v30 }
 0x2c6   :  { %v891_v48 = vadd.f32 %v865_v21, %v843_v53  ;;  %v1641_v5 = vpop.eup %1640  ;;  %v851_v12 = vmul.f32 %v1639_v8, %v835_v20 }
 0x2c7   :  { %v1330_v7 = vsub.f32 %v1259_v58, %v1307_v59  ;;  %v1277_v63 = vld [vmem:[#allocation3 + $0x18] sm:$0xff]  ;;  %915 = vst.msk [vmem:[#allocation3 + $0x60] sm:$0xff] %vm3197_vm9, %v898_v26  ;;  %v1643_v19 = vpop.eup %1642  ;;  %v1245_v32 = vmul.f32 %v1641_v5, %v1227_v39  ;;  %v1173_v58 = vmax.f32 %v2834_v3, 1.0  ;;  %v2839_v59 = vld [vmem:[#allocation5 + $0x68] sm:$0xff]  ;;  %v1229_v23 = vsub.f32 %v1181_v31, %v1213_v61 }
 0x2c8   :  { %1662 = vlog2.f32 %v1277_v63  ;;  %908 = vst.msk [vmem:[#allocation3 + $0x28] sm:$0xff] %vm3198_vm5, %v891_v48  ;;  %v845_v42 = vmul.f32 %v1643_v19, %v829_v51  ;;  %v1175_v57 = vmax.f32 %v2839_v59, 1.0  ;;  %vm1341_vm9 = vcmp.gt.f32.partialorder %v2807_v30, 0.0  ;;  %vm3208_vm5 = vmmov %vm3202_vm1 }
 0x2c9   :  { %v1645_v17 = vpop.eup %1644  ;;  %1664 = vrcp.f32 %v1166_v11  ;;  %v1362_v47 = vmul.f32 -1.0, %v1330_v7  ;;  %v881_v33 = vpop.xlane.xlu0 %880  ;;  %v1198_v7 = vld [vmem:[#allocation2 + $0x20] sm:$0xff] }
 0x2ca   :  { %v1293_v6 = vmul.f32 0.6931472, %v1645_v17  ;;  %v1278_v60 = vld [vmem:[#allocation3 + $0x20] sm:$0xff]  ;;  %v899_v24 = vadd.f32 %v881_v33, %v851_v12  ;;  %v1647_v52 = vpop.eup %1646  ;;  %v1214_v2 = vmul.f32 %v1198_v7, %v2810_v14  ;;  %v2852_v33 = vld [vmem:[#allocation5 + $0x78] sm:$0xff] }
 0x2cb   :  { %v1378_v44 = vsel %vm1346_vm4, %v1362_v47, 0.0  ;;  %1666 = vlog2.f32 %v1278_v60  ;;  %v1649_v36 = vpop.eup %1648  ;;  %v1285_v40 = vld [vmem:[#allocation3 + $0x58] sm:$0xff]  ;;  %v853_v8 = vmul.f32 %v1647_v52, %v837_v25  ;;  %vm1342_vm4 = vcmp.gt.f32.partialorder %v2810_v14, 0.0 }
 0x2cc   :  { %1394 = vst.msk [vmem:[%s2963_s4 + $0x40] sm:$0xff] %vm3199_vm13, %v1378_v44  ;;  %v1323_v49 = vsub.f32 %v1245_v32, %v1293_v6  ;;  %v1261_v9 = vmul.f32 %v1649_v36, %v1235_v18  ;;  %1668 = vrcp.f32 %v1167_v13  ;;  %v1230_v18 = vsub.f32 %v1182_v34, %v1214_v2  ;;  %v1183_v44 = vld [vmem:[#allocation4 + $0x28] sm:$0xff]  ;;  %vm3209_vm13 = vmmov %vm3202_vm1 }
 0x2cd   :  { %916 = vst.msk [vmem:[#allocation3 + $0x68] sm:$0xff] %vm3200_vm2, %v899_v24  ;;  %v1651_v29 = vpop.eup %1650  ;;  %v869_v15 = vpop.xlane.xlu0 %868  ;;  %v1199_v24 = vld [vmem:[#allocation2 + $0x28] sm:$0xff]  ;;  %v1177_v36 = vmax.f32 %v2852_v33, 1.0  ;;  %vm3210_vm2 = vmmov %vm3202_vm1 }
 0x2ce   :  { %v1653_v1 = vpop.eup %1652  ;;  %v1355_v16 = vmul.f32 -1.0, %v1323_v49  ;;  %v1309_v35 = vmul.f32 0.6931472, %v1651_v29  ;;  %v893_v4 = vadd.f32 %v869_v15, %v845_v42  ;;  %v948_v42 = vld [vmem:[#allocation4 + $0x68] sm:$0xff]  ;;  %v1215_v29 = vmul.f32 %v1199_v24, %v2818_v37 }
 0x2cf   :  { %v1655_v22 = vpop.eup %1654  ;;  %v1279_v53 = vld [vmem:[#allocation3 + $0x28] sm:$0xff]  ;;  %v1243_v39 = vmul.f32 %v1653_v1, %v1226_v0 }
 0x2d0   :  { %v1657_v11 = vpop.eup %1656  ;;  %v1371_v26 = vsel %vm1339_vm10, %v1355_v16, 0.0  ;;  %v1331_v21 = vsub.f32 %v1261_v9, %v1309_v35  ;;  %1670 = vlog2.f32 %v1279_v53  ;;  %910 = vst.msk [vmem:[#allocation3 + $0x38] sm:$0xff] %vm3201_vm15, %v893_v4  ;;  %v1247_v48 = vmul.f32 %v1655_v22, %v1228_v50  ;;  %v950_v4 = vld [vmem:[#allocation4 + $0x78] sm:$0xff]  ;;  %vm3211_vm10 = vmmov %vm3202_vm1  ;;  %v1207_v34 = vld [vmem:[#allocation2 + $0x68] sm:$0xff] }
 0x2d1   :  { %v1659_v20 = vpop.eup %1658  ;;  %1387 = vst.msk [vmem:[%s2963_s4 + $0x8] sm:$0xff] %vm3202_vm1, %v1371_v26  ;;  %v1295_v5 = vmul.f32 0.6931472, %v1657_v11  ;;  %v885_v38 = vpop.xlane.xlu0 %884  ;;  %1672 = vlog2.f32 %v1285_v40  ;;  %v1231_v1 = vsub.f32 %v1183_v44, %v1215_v29  ;;  %v1205_v40 = vld [vmem:[#allocation2 + $0x58] sm:$0xff]  ;;  %vm1343_vm15 = vcmp.gt.f32.partialorder %v2818_v37, 0.0 }
 0x2d2   :  { %v1363_v63 = vmul.f32 -1.0, %v1331_v21  ;;  %v1291_v56 = vmul.f32 0.6931472, %v1659_v20  ;;  %v901_v19 = vadd.f32 %v885_v38, %v853_v8  ;;  %v1661_v47 = vpop.eup %1660  ;;  %1674 = vrcp.f32 %v1173_v58  ;;  %v1201_v8 = vld [vmem:[#allocation2 + $0x38] sm:$0xff] }
 0x2d3   :  { %v1324_v12 = vsub.f32 %v1247_v48, %v1295_v5  ;;  %1676 = vrcp.f32 %v1169_v54  ;;  %v1249_v10 = vmul.f32 %v1661_v47, %v1229_v23  ;;  %v1221_v11 = vmul.f32 %v1205_v40, %v2834_v3  ;;  %v1185_v26 = vld [vmem:[#allocation4 + $0x38] sm:$0xff] }
 0x2d4   :  { %v1287_v17 = vld [vmem:[#allocation3 + $0x68] sm:$0xff]  ;;  %v1379_v51 = vsel %vm1347_vm7, %v1363_v63, 0.0  ;;  %v1322_v32 = vsub.f32 %v1243_v39, %v1291_v56  ;;  %918 = vst.msk [vmem:[#allocation3 + $0x78] sm:$0xff] %vm3203_vm14, %v901_v19  ;;  %v1217_v39 = vmul.f32 %v1201_v8, %v2826_v46  ;;  %v1223_v19 = vmul.f32 %v1207_v34, %v2839_v59  ;;  %v836_v8 = vld [vmem:[#allocation3 + $0x70] sm:$0xff] }
 0x2d5   :  { %v1663_v62 = vpop.eup %1662  ;;  %1395 = vst.msk [vmem:[%s2963_s4 + $0x48] sm:$0xff] %vm3204_vm12, %v1379_v51  ;;  %v1356_v41 = vmul.f32 -1.0, %v1324_v12  ;;  %v990_v6 = vpop.xlane.xlu0 %989  ;;  %1678 = vlog2.f32 %v1287_v17  ;;  %v1209_v51 = vld [vmem:[#allocation2 + $0x78] sm:$0xff]  ;;  %vm1349_vm7 = vcmp.gt.f32.partialorder %v2834_v3, 0.0  ;;  %vm1345_vm14 = vcmp.gt.f32.partialorder %v2826_v46, 0.0  ;;  %v3216_v46 = vld [vmem:[#allocation20_spill] sm:$0xff] }
 0x2d6   :  { %v1665_v60 = vpop.eup %1664  ;;  %v1354_v52 = vmul.f32 -1.0, %v1322_v32  ;;  %v1297_v28 = vmul.f32 0.6931472, %v1663_v62  ;;  %v1010_v13 = vadd.f32 %v990_v6, %v946_v43  ;;  %1680 = vrcp.f32 %v1175_v57  ;;  %v2928_v34 = vld [vmem:[#allocation5 + $0x70] sm:$0xff] }
 0x2d7   :  { %v1372_v55 = vsel %vm1340_vm0, %v1356_v41, 0.0  ;;  %v1281_v49 = vld [vmem:[#allocation3 + $0x38] sm:$0xff]  ;;  %v1251_v45 = vmul.f32 %v1665_v60, %v1230_v18  ;;  %v1233_v63 = vsub.f32 %v1185_v26, %v1217_v39  ;;  %v1225_v41 = vmul.f32 %v1209_v51, %v2852_v33  ;;  %vm3212_vm0 = vmmov %vm3202_vm1  ;;  %v1284_v26 = vld [vmem:[#allocation3 + $0x50] sm:$0xff] }
 0x2d8   :  { %v1667_v25 = vpop.eup %1666  ;;  %1388 = vst.msk [vmem:[%s2963_s4 + $0x10] sm:$0xff] %vm3205_vm3, %v1372_v55  ;;  %v1370_v0 = vsel %vm1338_vm11, %v1354_v52, 0.0  ;;  %v1325_v50 = vsub.f32 %v1249_v10, %v1297_v28  ;;  %1682 = vlog2.f32 %v1281_v49  ;;  %vm1351_vm12 = vcmp.gt.f32.partialorder %v2839_v59, 0.0  ;;  %vm3213_vm11 = vmmov %vm3212_vm0  ;;  %v3217_v59 = vld [vmem:[#allocation18_spill] sm:$0xff]  ;;  %v1204_v51 = vld [vmem:[#allocation2 + $0x50] sm:$0xff] }
 0x2d9   :  { %1026 = vst.msk [vmem:[#allocation4 + $0x58] sm:$0xff] %vm3206_vm6, %v1010_v13  ;;  %v1299_v27 = vmul.f32 0.6931472, %v1667_v25  ;;  %v994_v15 = vpop.xlane.xlu0 %993  ;;  %1684 = vrcp.f32 %v1177_v36  ;;  %v1669_v22 = vpop.eup %1668  ;;  %vm3214_vm3 = vmmov %vm3212_vm0  ;;  %vm1353_vm6 = vcmp.gt.f32.partialorder %v2852_v33, 0.0 }
 0x2da   :  { %1386 = vst.msk [vmem:[%s2963_s4] sm:$0xff] %vm3207_vm8, %v1370_v0  ;;  %v1357_v31 = vmul.f32 -1.0, %v1325_v50  ;;  %v1012_v9 = vadd.f32 %v994_v15, %v948_v42  ;;  %v1253_v58 = vmul.f32 %v1669_v22, %v1231_v1  ;;  %vm3215_vm8 = vmmov %vm3212_vm0 }
 0x2db   :  { %v1326_v16 = vsub.f32 %v1251_v45, %v1299_v27  ;;  %v1289_v35 = vld [vmem:[#allocation3 + $0x78] sm:$0xff] }
 0x2dc   :  { %v1373_v61 = vsel %vm1341_vm9, %v1357_v31, 0.0  ;;  %1686 = vlog2.f32 %v1289_v35  ;;  %1028 = vst.msk [vmem:[#allocation4 + $0x68] sm:$0xff] %vm3208_vm5, %v1012_v9  ;;  %v636_v31 = vsub.f32 %v3217_v59, %v3216_v46  ;;  %v3219_v35 = vld [vmem:[#allocation22_spill] sm:$0xff]  ;;  %vm3220_vm9 = vmmov %vm3212_vm0 }
 0x2dd   :  { %v1671_v54 = vpop.eup %1670  ;;  %1389 = vst.msk [vmem:[%s2963_s4 + $0x18] sm:$0xff] %vm3209_vm13, %v1373_v61  ;;  %v1358_v53 = vmul.f32 -1.0, %v1326_v16  ;;  %v998_v30 = vpop.xlane.xlu0 %997  ;;  %v3218_v16 = vld [vmem:[#allocation24_spill] sm:$0xff]  ;;  %vm3221_vm5 = vmmov %vm3212_vm0 }
 0x2de   :  { %v1301_v21 = vmul.f32 0.6931472, %v1671_v54  ;;  %v1014_v20 = vadd.f32 %v998_v30, %v950_v4  ;;  %v1673_v23 = vpop.eup %1672  ;;  %v658_v9 = vmul.f32 1.442695, %v636_v31  ;;  %v644_v4 = vsub.f32 %v3219_v35, %v3218_v16  ;;  %v828_v54 = vld [vmem:[#allocation3 + $0x30] sm:$0xff]  ;;  %vm3223_vm13 = vmmov %vm3212_vm0 }
 0x2df   :  { %v1374_v48 = vsel %vm1342_vm4, %v1358_v53, 0.0  ;;  %v1675_v7 = vpop.eup %1674  ;;  %v1313_v2 = vmul.f32 0.6931472, %v1673_v23  ;;  %v2918_v53 = vld [vmem:[#allocation5 + $0x50] sm:$0xff]  ;;  %vm3222_vm4 = vmmov %vm3212_vm0 }
 0x2e0   :  { %v1189_v5 = vld [vmem:[#allocation4 + $0x58] sm:$0xff]  ;;  %1390 = vst.msk [vmem:[%s2963_s4 + $0x20] sm:$0xff] %vm3210_vm2, %v1374_v48  ;;  %v1327_v14 = vsub.f32 %v1253_v58, %v1301_v21  ;;  %v1677_v56 = vpop.eup %1676  ;;  %1688 = vpow2.f32 %v658_v9  ;;  %v674_v22 = vmul.f32 1.442695, %v644_v4  ;;  %v1172_v21 = vmax.f32 %v2918_v53, 1.0  ;;  %vm3224_vm2 = vmmov %vm3212_vm0 }
 0x2e1   :  { %v1237_v38 = vsub.f32 %v1189_v5, %v1221_v11  ;;  %1030 = vst.msk [vmem:[#allocation4 + $0x78] sm:$0xff] %vm3211_vm10, %v1014_v20  ;;  %v1257_v6 = vmul.f32 %v1677_v56, %v1233_v63  ;;  %v2920_v11 = vld [vmem:[#allocation5 + $0x30] sm:$0xff]  ;;  %v2923_v20 = vld [vmem:[#allocation5 + $0x60] sm:$0xff]  ;;  %vm1348_vm10 = vcmp.gt.f32.partialorder %v2918_v53, 0.0 }
 0x2e2   :  { %v1359_v57 = vmul.f32 -1.0, %v1327_v14  ;;  %v1679_v17 = vpop.eup %1678  ;;  %1690 = vpow2.f32 %v674_v22  ;;  %v1168_v39 = vmax.f32 %v2920_v11, 1.0  ;;  %v1174_v14 = vmax.f32 %v2923_v20, 1.0 }
 0x2e3   :  { %v1265_v12 = vmul.f32 %v1675_v7, %v1237_v38  ;;  %v1191_v43 = vld [vmem:[#allocation4 + $0x68] sm:$0xff]  ;;  %v1681_v47 = vpop.eup %1680  ;;  %v1317_v60 = vmul.f32 0.6931472, %v1679_v17  ;;  %1692 = vlog2.f32 %v1284_v26  ;;  %v1286_v38 = vld [vmem:[#allocation3 + $0x60] sm:$0xff]  ;;  %v945_v7 = vld [vmem:[#allocation4 + $0x50] sm:$0xff] }
 0x2e4   :  { %v1375_v32 = vsel %vm1343_vm15, %v1359_v57, 0.0  ;;  %v1239_v10 = vsub.f32 %v1191_v43, %v1223_v19  ;;  %1694 = vrcp.f32 %v1172_v21  ;;  %v1176_v19 = vmax.f32 %v2928_v34, 1.0  ;;  %v947_v57 = vld [vmem:[#allocation4 + $0x60] sm:$0xff]  ;;  %vm3225_vm15 = vmmov %vm3212_vm0 }
 0x2e5   :  { %v1333_v62 = vsub.f32 %v1265_v12, %v1313_v2  ;;  %v1683_v18 = vpop.eup %1682  ;;  %1391 = vst.msk [vmem:[%s2963_s4 + $0x28] sm:$0xff] %vm3202_vm1, %v1375_v32  ;;  %1696 = vrcp.f32 %v1168_v39  ;;  %vm1344_vm1 = vcmp.gt.f32.partialorder %v2920_v11, 0.0 }
 0x2e6   :  { %v1305_v24 = vmul.f32 0.6931472, %v1683_v18  ;;  %v1269_v28 = vmul.f32 %v1681_v47, %v1239_v10  ;;  %v1685_v13 = vpop.eup %1684  ;;  %1698 = vlog2.f32 %v1286_v38  ;;  %v949_v47 = vld [vmem:[#allocation4 + $0x70] sm:$0xff]  ;;  %v1220_v10 = vmul.f32 %v1204_v51, %v2918_v53 }
 0x2e7   :  { %v1365_v52 = vmul.f32 -1.0, %v1333_v62  ;;  %1700 = vrcp.f32 %v1174_v14  ;;  %v1200_v62 = vld [vmem:[#allocation2 + $0x30] sm:$0xff] }
 0x2e8   :  { %v1193_v37 = vld [vmem:[#allocation4 + $0x78] sm:$0xff]  ;;  %v1329_v44 = vsub.f32 %v1257_v6, %v1305_v24  ;;  %v1335_v55 = vsub.f32 %v1269_v28, %v1317_v60  ;;  %v1184_v18 = vld [vmem:[#allocation4 + $0x30] sm:$0xff]  ;;  %v1216_v60 = vmul.f32 %v1200_v62, %v2920_v11 }
 0x2e9   :  { %v1381_v36 = vsel %vm1349_vm7, %v1365_v52, 0.0  ;;  %v1241_v49 = vsub.f32 %v1193_v37, %v1225_v41  ;;  %v1687_v42 = vpop.eup %1686  ;;  %v1206_v37 = vld [vmem:[#allocation2 + $0x60] sm:$0xff]  ;;  %vm1350_vm7 = vcmp.gt.f32.partialorder %v2923_v20, 0.0 }
 0x2ea   :  { %1397 = vst.msk [vmem:[%s2963_s4 + $0x58] sm:$0xff] %vm3212_vm0, %v1381_v36  ;;  %v1361_v25 = vmul.f32 -1.0, %v1329_v44  ;;  %v1321_v29 = vmul.f32 0.6931472, %v1687_v42  ;;  %v1367_v0 = vmul.f32 -1.0, %v1335_v55  ;;  %v1222_v36 = vmul.f32 %v1206_v37, %v2923_v20 }
 0x2eb   :  { %v1273_v50 = vmul.f32 %v1685_v13, %v1241_v49  ;;  %v1232_v13 = vsub.f32 %v1184_v18, %v1216_v60 }
 0x2ec   :  { %v1377_v3 = vsel %vm1345_vm14, %v1361_v25, 0.0  ;;  %v1383_v45 = vsel %vm1351_vm12, %v1367_v0, 0.0  ;;  %v1208_v0 = vld [vmem:[#allocation2 + $0x70] sm:$0xff]  ;;  %vm3226_vm14 = vmmov %vm3212_vm0  ;;  %vm1352_vm12 = vcmp.gt.f32.partialorder %v2928_v34, 0.0 }
 0x2ed   :  { %v1337_v27 = vsub.f32 %v1273_v50, %v1321_v29  ;;  %1393 = vst.msk [vmem:[%s2963_s4 + $0x38] sm:$0xff] %vm3213_vm11, %v1377_v3  ;;  %v1689_v61 = vpop.eup %1688  ;;  %vm3227_vm11 = vmmov %vm3212_vm0 }
 0x2ee   :  { %1399 = vst.msk [vmem:[%s2963_s4 + $0x68] sm:$0xff] %vm3214_vm3, %v1383_v45  ;;  %v844_v40 = vmul.f32 %v1689_v61, %v828_v54 }
 0x2ef   :  { %v1369_v15 = vmul.f32 -1.0, %v1337_v27  ;;  %v1691_v33 = vpop.eup %1690  ;;  %v1224_v27 = vmul.f32 %v1208_v0, %v2928_v34 }
 0x2f0   :  { %v852_v23 = vmul.f32 %v1691_v33, %v836_v8  ;;  %v1693_v6 = vpop.eup %1692 }
 0x2f1   :  { %v1385_v1 = vsel %vm1353_vm6, %v1369_v15, 0.0  ;;  %v1695_v28 = vpop.eup %1694  ;;  %v1311_v55 = vmul.f32 0.6931472, %v1693_v6 }
 0x2f2   :  { %1401 = vst.msk [vmem:[%s2963_s4 + $0x78] sm:$0xff] %vm3215_vm8, %v1385_v1  ;;  %v1697_v44 = vpop.eup %1696 }
 0x2f3   :  { %v1699_v42 = vpop.eup %1698  ;;  %v1255_v15 = vmul.f32 %v1697_v44, %v1232_v13 }
 0x2f4   :  { %v1701_v29 = vpop.eup %1700  ;;  %v1315_v1 = vmul.f32 0.6931472, %v1699_v42 }
 0x315   :  { %v867_v30 = vpop.xlane.xlu1 %866 }
 0x316   :  { %v892_v58 = vadd.f32 %v867_v30, %v844_v40 }
 0x318   :  { %909 = vst.msk [vmem:[#allocation3 + $0x30] sm:$0xff] %vm3220_vm9, %v892_v58 }
 0x319   :  { %v883_v48 = vpop.xlane.xlu1 %882 }
 0x31a   :  { %v900_v5 = vadd.f32 %v883_v48, %v852_v23 }
 0x31c   :  { %917 = vst.msk [vmem:[#allocation3 + $0x70] sm:$0xff] %vm3221_vm5, %v900_v5 }
 0x31d   :  { %v988_v63 = vpop.xlane.xlu1 %987 }
 0x31e   :  { %v1009_v56 = vadd.f32 %v988_v63, %v945_v7 }
 0x31f   :  { %v1280_v2 = vld [vmem:[#allocation3 + $0x30] sm:$0xff] }
 0x320   :  { %1702 = vlog2.f32 %v1280_v2  ;;  %1025 = vst.msk [vmem:[#allocation4 + $0x50] sm:$0xff] %vm3222_vm4, %v1009_v56 }
 0x321   :  { %v992_v12 = vpop.xlane.xlu1 %991  ;;  %1704 = vrcp.f32 %v1176_v19 }
 0x322   :  { %v1011_v17 = vadd.f32 %v992_v12, %v947_v57 }
 0x323   :  { %v1288_v43 = vld [vmem:[#allocation3 + $0x70] sm:$0xff] }
 0x324   :  { %1706 = vlog2.f32 %v1288_v43  ;;  %1027 = vst.msk [vmem:[#allocation4 + $0x60] sm:$0xff] %vm3223_vm13, %v1011_v17 }
 0x325   :  { %v996_v32 = vpop.xlane.xlu1 %995 }
 0x326   :  { %v1013_v41 = vadd.f32 %v996_v32, %v949_v47 }
 0x327   :  { %v1188_v24 = vld [vmem:[#allocation4 + $0x50] sm:$0xff] }
 0x328   :  { %v1236_v52 = vsub.f32 %v1188_v24, %v1220_v10  ;;  %1029 = vst.msk [vmem:[#allocation4 + $0x70] sm:$0xff] %vm3224_vm2, %v1013_v41 }
 0x32a   :  { %v1263_v49 = vmul.f32 %v1695_v28, %v1236_v52 }
 0x32b   :  { %v1190_v25 = vld [vmem:[#allocation4 + $0x60] sm:$0xff] }
 0x32c   :  { %v1332_v50 = vsub.f32 %v1263_v49, %v1311_v55  ;;  %v1238_v3 = vsub.f32 %v1190_v25, %v1222_v36 }
 0x32d   :  { %v1703_v45 = vpop.eup %1702 }
 0x32e   :  { %v1303_v46 = vmul.f32 0.6931472, %v1703_v45  ;;  %v1364_v59 = vmul.f32 -1.0, %v1332_v50  ;;  %v1267_v31 = vmul.f32 %v1701_v29, %v1238_v3  ;;  %v1705_v16 = vpop.eup %1704 }
 0x32f   :  { %v1192_v9 = vld [vmem:[#allocation4 + $0x70] sm:$0xff] }
 0x330   :  { %v1328_v35 = vsub.f32 %v1255_v15, %v1303_v46  ;;  %v1380_v4 = vsel %vm1348_vm10, %v1364_v59, 0.0  ;;  %v1334_v22 = vsub.f32 %v1267_v31, %v1315_v1  ;;  %v1240_v61 = vsub.f32 %v1192_v9, %v1224_v27 }
 0x331   :  { %v1707_v54 = vpop.eup %1706  ;;  %1396 = vst.msk [vmem:[%s2963_s4 + $0x50] sm:$0xff] %vm3225_vm15, %v1380_v4 }
 0x332   :  { %v1360_v40 = vmul.f32 -1.0, %v1328_v35  ;;  %v1319_v33 = vmul.f32 0.6931472, %v1707_v54  ;;  %v1366_v30 = vmul.f32 -1.0, %v1334_v22  ;;  %v1271_v8 = vmul.f32 %v1705_v16, %v1240_v61 }
 0x334   :  { %v1376_v53 = vsel %vm1344_vm1, %v1360_v40, 0.0  ;;  %v1382_v58 = vsel %vm1350_vm7, %v1366_v30, 0.0  ;;  %v1336_v26 = vsub.f32 %v1271_v8, %v1319_v33 }
 0x335   :  { %1392 = vst.msk [vmem:[%s2963_s4 + $0x30] sm:$0xff] %vm3212_vm0, %v1376_v53 }
 0x336   :  { %1398 = vst.msk [vmem:[%s2963_s4 + $0x60] sm:$0xff] %vm3226_vm14, %v1382_v58  ;;  %v1368_v21 = vmul.f32 -1.0, %v1336_v26 }
 0x338   :  { %v1384_v23 = vsel %vm1352_vm12, %v1368_v21, 0.0 }
 0x339   :  { %1400 = vst.msk [vmem:[%s2963_s4 + $0x70] sm:$0xff] %vm3227_vm11, %v1384_v23 }

</bundles_post_ra>
